<compile_context>
chip_gen: v7x
topology: tpu7x:2x2x1
jax: 0.10.0
libtpu: 0.0.40
codegen_flags: <defaults>
</compile_context>

<pallas_src>
import jax
import jax.numpy as jnp
import numpy as np
from jax.experimental import pallas as pl
from jax.experimental.pallas import tpu as pltpu


def _store_kw_shifted(s_ref, r0, v):
    """Store v (rows, W, C) into s_ref[r0:r0+rows] with the three kw-shifted
    copies packed along the lane axis:
        s_ref[r0+r, w, kw*C + c] == v[r, w + kw - 1, c]   (zero outside [0, W))
    The two zero boundary columns (w==0 @ kw=0, w==W-1 @ kw=2) are written by
    _zero_pad_cols, not here."""
    rows, W, C = v.shape
    s_ref[r0:r0 + rows, :, C:2 * C] = v                          # kw = 1 (center)
    s_ref[r0:r0 + rows, 1:, 0:C] = v[:, :W - 1, :]               # kw = 0 (w - 1)
    s_ref[r0:r0 + rows, :W - 1, 2 * C:3 * C] = v[:, 1:, :]       # kw = 2 (w + 1)


def _zero_pad_cols(s_ref, C):
    """Zero the two boundary columns of a kw-packed scratch (W zero padding)."""
    R, W, _ = s_ref.shape
    s_ref[:, 0:1, 0:C] = jnp.zeros((R, 1, C), s_ref.dtype)
    s_ref[:, W - 1:W, 2 * C:3 * C] = jnp.zeros((R, 1, C), s_ref.dtype)


def _make_kernel(H, band, W, cin, cf):
    rows1 = band + 2   # intermediate (conv1/PReLU) rows per band, incl. 1-row halo each side

    def kernel(xb_ref, xt0_ref, xt1_ref, xd0_ref, xd1_ref,
               w1_ref, b1_ref, alpha_ref, w2_ref, b2_ref,
               out_ref, s1_ref, s2_ref):
        # xb_ref  : (1, band, W, cin)  body rows [b*band, (b+1)*band)
        # xt*_ref : (1, 1, W, cin)     top halo rows b*band-2, b*band-1 (clamped)
        # xd*_ref : (1, 1, W, cin)     bottom halo rows (b+1)*band, +1 (clamped)
        # w1_ref  : (3, 3*cin, cf)     kw-folded weights, VMEM resident
        # b1_ref  : (1, cf) f32        VMEM
        # alpha   : (1,)    f32        SMEM (PReLU shared weight)
        # w2_ref  : (3, 3*cf, cf)
        # out_ref : (1, band, W, cf)
        # s1_ref  : (band+4, W, 3*cin) kw-packed input slab
        # s2_ref  : (band+2, W, 3*cf)  kw-packed PReLU(conv1) slab
        b = pl.program_id(1)

        # ---- stage the band+4 input rows as kw-packed planes --------------
        _zero_pad_cols(s1_ref, cin)

        def halo(ref, row_idx):
            v = ref[0]                                    # (1, W, cin)
            oob = jnp.logical_or(row_idx < 0, row_idx >= H)
            return jnp.where(oob, jnp.zeros_like(v), v)   # zero pad rows along H

        _store_kw_shifted(s1_ref, 0, halo(xt0_ref, b * band - 2))
        _store_kw_shifted(s1_ref, 1, halo(xt1_ref, b * band - 1))
        _store_kw_shifted(s1_ref, 2, xb_ref[0])
        _store_kw_shifted(s1_ref, band + 2, halo(xd0_ref, (b + 1) * band))
        _store_kw_shifted(s1_ref, band + 3, halo(xd1_ref, (b + 1) * band + 1))

        # ---- conv1 + bias: 3 matmuls with K = 3*cin, value accumulation ----
        acc1 = jnp.broadcast_to(b1_ref[...], (rows1 * W, cf)).astype(jnp.float32)
        for kh in range(3):
            patch = s1_ref[kh:kh + rows1].reshape(rows1 * W, 3 * cin)
            acc1 = acc1 + jnp.dot(patch, w1_ref[kh],
                                  preferred_element_type=jnp.float32)

        # ---- PReLU (single shared weight, torch nn.PReLU() default) -------
        alpha = alpha_ref[0]
        y1 = jnp.where(acc1 >= 0.0, acc1, alpha * acc1)

        # ---- stage PReLU(conv1) rows as kw-packed planes -------------------
        _zero_pad_cols(s2_ref, cf)
        _store_kw_shifted(s2_ref, 0, y1.reshape(rows1, W, cf).astype(s2_ref.dtype))

        # conv2's H zero padding: the intermediate rows just outside the image
        # must be zero, NOT PReLU(conv1(zero rows)).
        @pl.when(b == 0)
        def _top():
            s2_ref[0:1] = jnp.zeros((1, W, 3 * cf), s2_ref.dtype)

        @pl.when(b == pl.num_programs(1) - 1)
        def _bot():
            s2_ref[rows1 - 1:rows1] = jnp.zeros((1, W, 3 * cf), s2_ref.dtype)

        # ---- conv2 + bias ---------------------------------------------------
        acc2 = jnp.broadcast_to(b2_ref[...], (band * W, cf)).astype(jnp.float32)
        for kh in range(3):
            patch = s2_ref[kh:kh + band].reshape(band * W, 3 * cf)
            acc2 = acc2 + jnp.dot(patch, w2_ref[kh],
                                  preferred_element_type=jnp.float32)

        out_ref[0] = acc2.reshape(band, W, cf).astype(out_ref.dtype)

    return kernel


def _pick_band(H, W, cin, cf, itemsize):
    """Largest divisor of H whose per-step working set fits a few MiB
    (scratch slabs + double-buffered in/out blocks + f32 value accumulators)."""
    budget = 6 * 1024 * 1024
    per_row = W * (3 * cin + 3 * cf) * itemsize      # s1 + s2 scratch
    per_row += 2 * W * (cin + cf) * itemsize         # double-buffered in/out blocks
    per_row += 2 * W * cf * 4                        # f32 traced accumulators
    band = 1
    for cand in range(1, H + 1):
        if H % cand == 0 and cand * per_row <= budget:
            band = cand
    return band


def _vmem_limit_bytes():
    limit = 64 * 1024 * 1024
    try:
        cap = int(pltpu.get_tpu_info().vmem_capacity_bytes)
        limit = min(cap * 3 // 4, 100 * 1024 * 1024)   # ~48 MiB on v7x, ~96 MiB on v5e/v6e
    except Exception:
        pass
    return limit


def feature_extractor(x_nchw, w1, b1, alpha, w2, b2, *,
                      compute_dtype=jnp.bfloat16, band=None):
    """FeatureExtractor forward.  x_nchw: (N, Cin, H, W); w1: (Cf, Cin, 3, 3),
    w2: (Cf, Cf, 3, 3) torch OIHW; b1/b2: (Cf,); alpha: PReLU scalar weight.
    Returns (N, Cf, H, W).  Pass zero biases to emulate use_bias=False."""
    N, cin, H, W = map(int, x_nchw.shape)
    cf = int(w1.shape[0])

    # NOTE: keep activations NHWC across chained blocks in a real model; these
    # edge transposes are full HBM round trips.
    x = jnp.transpose(x_nchw, (0, 2, 3, 1)).astype(compute_dtype)           # NHWC
    w1_k = jnp.transpose(w1, (2, 3, 1, 0)).reshape(3, 3 * cin, cf).astype(compute_dtype)
    w2_k = jnp.transpose(w2, (2, 3, 1, 0)).reshape(3, 3 * cf, cf).astype(compute_dtype)
    b1_k = jnp.asarray(b1, jnp.float32).reshape(1, cf)
    b2_k = jnp.asarray(b2, jnp.float32).reshape(1, cf)
    alpha_k = jnp.asarray(alpha, jnp.float32).reshape(1)

    if band is None:
        band = _pick_band(H, W, cin, cf, jnp.dtype(compute_dtype).itemsize)
    if H % band != 0:
        raise ValueError(f"band={band} must divide H={H}")
    nb = H // band

    out_dtype = jnp.float32 if compute_dtype == jnp.float32 else jnp.bfloat16
    kernel = _make_kernel(H, band, W, cin, cf)

    vmem = pltpu.MemorySpace.VMEM
    smem = pltpu.MemorySpace.SMEM

    in_specs = [
        pl.BlockSpec((1, band, W, cin), lambda n, b: (n, b, 0, 0)),          # body rows
        pl.BlockSpec((1, 1, W, cin),
                     lambda n, b: (n, jnp.maximum(b * band - 2, 0), 0, 0)),  # halo b*band-2
        pl.BlockSpec((1, 1, W, cin),
                     lambda n, b: (n, jnp.maximum(b * band - 1, 0), 0, 0)),  # halo b*band-1
        pl.BlockSpec((1, 1, W, cin),
                     lambda n, b: (n, jnp.minimum((b + 1) * band, H - 1), 0, 0)),      # halo
        pl.BlockSpec((1, 1, W, cin),
                     lambda n, b: (n, jnp.minimum((b + 1) * band + 1, H - 1), 0, 0)),  # halo
        pl.BlockSpec(memory_space=vmem),   # w1 (whole-array resident, single-buffered)
        pl.BlockSpec(memory_space=vmem),   # b1
        pl.BlockSpec(memory_space=smem),   # PReLU alpha
        pl.BlockSpec(memory_space=vmem),   # w2
        pl.BlockSpec(memory_space=vmem),   # b2
    ]

    out = pl.pallas_call(
        kernel,
        out_shape=jax.ShapeDtypeStruct((N, H, W, cf), out_dtype),
        grid_spec=pltpu.PrefetchScalarGridSpec(
            num_scalar_prefetch=0,
            grid=(N, nb),
            in_specs=in_specs,
            out_specs=pl.BlockSpec((1, band, W, cf), lambda n, b: (n, b, 0, 0)),
            scratch_shapes=[
                pltpu.VMEM((band + 4, W, 3 * cin), compute_dtype),  # kw-packed input slab
                pltpu.VMEM((band + 2, W, 3 * cf), compute_dtype),   # kw-packed PReLU(conv1)
            ],
        ),
        compiler_params=pltpu.CompilerParams(
            dimension_semantics=("parallel", "parallel"),
            vmem_limit_bytes=_vmem_limit_bytes(),
        ),
    )(x, x, x, x, x, w1_k, b1_k, alpha_k, w2_k, b2_k)

    return jnp.transpose(out, (0, 3, 1, 2))    # back to NCHW for the caller


def _reference(x, w1, b1, alpha, w2, b2):
    """Pure-JAX f32 reference matching the PyTorch module (NCHW)."""
    def conv(v, w, b):
        y = jax.lax.conv_general_dilated(
            v, w, window_strides=(1, 1), padding=((1, 1), (1, 1)),
            dimension_numbers=("NCHW", "OIHW", "NCHW"))
        return y + b[None, :, None, None]

    y = conv(x, w1, b1)
    y = jnp.where(y >= 0.0, y, alpha * y)      # PReLU, shared scalar weight
    return conv(y, w2, b2)


if __name__ == "__main__":
    # FeatureExtractor(input_nc=4, ngf=32, use_bias=True), small test shapes.
    N, Cin, H, W, Cf = 2, 4, 16, 16, 32

    key = jax.random.PRNGKey(0)
    kx, kw1, kb1, kw2, kb2 = jax.random.split(key, 5)
    x = jax.random.normal(kx, (N, Cin, H, W), dtype=jnp.float32)
    w1 = jax.random.normal(kw1, (Cf, Cin, 3, 3), dtype=jnp.float32) * 0.1
    b1 = jax.random.normal(kb1, (Cf,), dtype=jnp.float32) * 0.1
    w2 = jax.random.normal(kw2, (Cf, Cf, 3, 3), dtype=jnp.float32) * 0.1
    b2 = jax.random.normal(kb2, (Cf,), dtype=jnp.float32) * 0.1
    alpha = jnp.float32(0.25)                  # nn.PReLU() default init

    ref = np.asarray(jax.block_until_ready(_reference(x, w1, b1, alpha, w2, b2)))

    # Exact path (f32 matmuls), 4 bands: exercises interior + both boundary bands.
    out = jax.block_until_ready(
        feature_extractor(x, w1, b1, alpha, w2, b2,
                          compute_dtype=jnp.float32, band=4))
    np.testing.assert_allclose(np.asarray(out, dtype=np.float32), ref,
                               rtol=1e-4, atol=2e-4)

    # Exact path, single band (both image boundaries handled in one grid step).
    out = jax.block_until_ready(
        feature_extractor(x, w1, b1, alpha, w2, b2,
                          compute_dtype=jnp.float32, band=16))
    np.testing.assert_allclose(np.asarray(out, dtype=np.float32), ref,
                               rtol=1e-4, atol=2e-4)

    # Fast path: bf16 MXU matmuls (f32 accumulation), bf16 internal output.
    out = jax.block_until_ready(
        feature_extractor(x, w1, b1, alpha, w2, b2,
                          compute_dtype=jnp.bfloat16, band=8))
    np.testing.assert_allclose(np.asarray(out.astype(jnp.float32)), ref,
                               rtol=5e-2, atol=1e-1)

    print("KERNEL_OK")
</pallas_src>

<mosaic_0001>
module attributes {stable_mosaic.version = 11 : i64} {
  func.func @kernel(%arg0: i32, %arg1: i32, %arg2: memref<1x4x16x4xf32, #tpu.memory_space<vmem>>, %arg3: memref<1x1x16x4xf32, #tpu.memory_space<vmem>>, %arg4: memref<1x1x16x4xf32, #tpu.memory_space<vmem>>, %arg5: memref<1x1x16x4xf32, #tpu.memory_space<vmem>>, %arg6: memref<1x1x16x4xf32, #tpu.memory_space<vmem>>, %arg7: memref<3x12x32xf32, #tpu.memory_space<vmem>>, %arg8: memref<1x32xf32, #tpu.memory_space<vmem>>, %arg9: memref<1xf32, #tpu.memory_space<smem>>, %arg10: memref<3x96x32xf32, #tpu.memory_space<vmem>>, %arg11: memref<1x32xf32, #tpu.memory_space<vmem>>, %arg12: memref<1x4x16x32xf32, #tpu.memory_space<vmem>>, %arg13: memref<8x16x12xf32, #tpu.memory_space<vmem>>, %arg14: memref<6x16x96xf32, #tpu.memory_space<vmem>>) attributes {dimension_semantics = [#tpu.dimension_semantics<parallel>, #tpu.dimension_semantics<parallel>], iteration_bounds = array<i64: 2, 4>, scalar_prefetch = 0 : i64, scratch_operands = 2 : i64, tpu.core_type = #tpu.core_type<tc>, window_params = [{transform_indices = @transform_0, window_bounds = array<i64: 1, 4, 16, 4>}, {transform_indices = @transform_1, window_bounds = array<i64: 1, 1, 16, 4>}, {transform_indices = @transform_2, window_bounds = array<i64: 1, 1, 16, 4>}, {transform_indices = @transform_3, window_bounds = array<i64: 1, 1, 16, 4>}, {transform_indices = @transform_4, window_bounds = array<i64: 1, 1, 16, 4>}, {pipeline_mode = #tpu.pipeline_mode<synchronous>, transform_indices = @transform_5, window_bounds = array<i64: 3, 12, 32>}, {pipeline_mode = #tpu.pipeline_mode<synchronous>, transform_indices = @transform_6, window_bounds = array<i64: 1, 32>}, {transform_indices = @transform_7, window_bounds = array<i64: 1>}, {pipeline_mode = #tpu.pipeline_mode<synchronous>, transform_indices = @transform_8, window_bounds = array<i64: 3, 96, 32>}, {pipeline_mode = #tpu.pipeline_mode<synchronous>, transform_indices = @transform_9, window_bounds = array<i64: 1, 32>}, {transform_indices = @transform_10, window_bounds = array<i64: 1, 4, 16, 32>}]} {
    %cst = arith.constant 0.000000e+00 : f32
    %0 = vector.broadcast %cst : f32 to vector<8x1x4xf32>
    %c0 = arith.constant 0 : index
    %c0_0 = arith.constant 0 : index
    %c0_1 = arith.constant 0 : index
    %1 = vector.load %arg13[%c0, %c0_0, %c0_1] : memref<8x16x12xf32, #tpu.memory_space<vmem>>, vector<8x1x4xf32>
    tpu.vector_store %arg13[%c0, %c0_0, %c0_1], %0 {strides = array<i32>} : memref<8x16x12xf32, #tpu.memory_space<vmem>>, vector<8x1x4xf32>,
    %cst_2 = arith.constant 0.000000e+00 : f32
    %2 = vector.broadcast %cst_2 : f32 to vector<8x1x4xf32>
    %c0_3 = arith.constant 0 : index
    %c15 = arith.constant 15 : index
    %c8 = arith.constant 8 : index
    %3 = vector.load %arg13[%c0_3, %c15, %c8] : memref<8x16x12xf32, #tpu.memory_space<vmem>>, vector<8x1x4xf32>
    tpu.vector_store %arg13[%c0_3, %c15, %c8], %2 {strides = array<i32>} : memref<8x16x12xf32, #tpu.memory_space<vmem>>, vector<8x1x4xf32>,
    %c4_i32 = arith.constant 4 : i32
    %4 = arith.muli %arg1, %c4_i32 : i32
    %c2_i32 = arith.constant 2 : i32
    %5 = arith.subi %4, %c2_i32 : i32
    %c0_4 = arith.constant 0 : index
    %c0_5 = arith.constant 0 : index
    %c0_6 = arith.constant 0 : index
    %c0_7 = arith.constant 0 : index
    %6 = vector.load %arg3[%c0_4, %c0_5, %c0_6, %c0_7] : memref<1x1x16x4xf32, #tpu.memory_space<vmem>>, vector<1x1x16x4xf32>
    %7 = vector.shape_cast %6 : vector<1x1x16x4xf32> to vector<1x16x4xf32>
    %c0_i32 = arith.constant 0 : i32
    %8 = arith.cmpi slt, %5, %c0_i32 : i32
    %c16_i32 = arith.constant 16 : i32
    %9 = arith.cmpi sge, %5, %c16_i32 : i32
    %10 = arith.ori %8, %9 : i1
    %cst_8 = arith.constant 0.000000e+00 : f32
    %11 = vector.broadcast %cst_8 : f32 to vector<1x16x4xf32>
    %12 = arith.select %10, %11, %7 : vector<1x16x4xf32>
    %c0_9 = arith.constant 0 : index
    %c0_10 = arith.constant 0 : index
    %c4 = arith.constant 4 : index
    %13 = vector.load %arg13[%c0_9, %c0_10, %c4] : memref<8x16x12xf32, #tpu.memory_space<vmem>>, vector<1x16x4xf32>
    tpu.vector_store %arg13[%c0_9, %c0_10, %c4], %12 {strides = array<i32>} : memref<8x16x12xf32, #tpu.memory_space<vmem>>, vector<1x16x4xf32>,
    %14 = vector.extract_strided_slice %12 {offsets = [0, 0, 0], sizes = [1, 15, 4], strides = [1, 1, 1]} : vector<1x16x4xf32> to vector<1x15x4xf32>
    %c0_11 = arith.constant 0 : index
    %c1 = arith.constant 1 : index
    %c0_12 = arith.constant 0 : index
    %15 = vector.load %arg13[%c0_11, %c1, %c0_12] : memref<8x16x12xf32, #tpu.memory_space<vmem>>, vector<1x15x4xf32>
    tpu.vector_store %arg13[%c0_11, %c1, %c0_12], %14 {strides = array<i32>} : memref<8x16x12xf32, #tpu.memory_space<vmem>>, vector<1x15x4xf32>,
    %16 = vector.extract_strided_slice %12 {offsets = [0, 1, 0], sizes = [1, 15, 4], strides = [1, 1, 1]} : vector<1x16x4xf32> to vector<1x15x4xf32>
    %c0_13 = arith.constant 0 : index
    %c0_14 = arith.constant 0 : index
    %c8_15 = arith.constant 8 : index
    %17 = vector.load %arg13[%c0_13, %c0_14, %c8_15] : memref<8x16x12xf32, #tpu.memory_space<vmem>>, vector<1x15x4xf32>
    tpu.vector_store %arg13[%c0_13, %c0_14, %c8_15], %16 {strides = array<i32>} : memref<8x16x12xf32, #tpu.memory_space<vmem>>, vector<1x15x4xf32>,
    %c4_i32_16 = arith.constant 4 : i32
    %18 = arith.muli %arg1, %c4_i32_16 : i32
    %c1_i32 = arith.constant 1 : i32
    %19 = arith.subi %18, %c1_i32 : i32
    %c0_17 = arith.constant 0 : index
    %c0_18 = arith.constant 0 : index
    %c0_19 = arith.constant 0 : index
    %c0_20 = arith.constant 0 : index
    %20 = vector.load %arg4[%c0_17, %c0_18, %c0_19, %c0_20] : memref<1x1x16x4xf32, #tpu.memory_space<vmem>>, vector<1x1x16x4xf32>
    %21 = vector.shape_cast %20 : vector<1x1x16x4xf32> to vector<1x16x4xf32>
    %c0_i32_21 = arith.constant 0 : i32
    %22 = arith.cmpi slt, %19, %c0_i32_21 : i32
    %c16_i32_22 = arith.constant 16 : i32
    %23 = arith.cmpi sge, %19, %c16_i32_22 : i32
    %24 = arith.ori %22, %23 : i1
    %cst_23 = arith.constant 0.000000e+00 : f32
    %25 = vector.broadcast %cst_23 : f32 to vector<1x16x4xf32>
    %26 = arith.select %24, %25, %21 : vector<1x16x4xf32>
    %c1_24 = arith.constant 1 : index
    %c0_25 = arith.constant 0 : index
    %c4_26 = arith.constant 4 : index
    %27 = vector.load %arg13[%c1_24, %c0_25, %c4_26] : memref<8x16x12xf32, #tpu.memory_space<vmem>>, vector<1x16x4xf32>
    tpu.vector_store %arg13[%c1_24, %c0_25, %c4_26], %26 {strides = array<i32>} : memref<8x16x12xf32, #tpu.memory_space<vmem>>, vector<1x16x4xf32>,
    %28 = vector.extract_strided_slice %26 {offsets = [0, 0, 0], sizes = [1, 15, 4], strides = [1, 1, 1]} : vector<1x16x4xf32> to vector<1x15x4xf32>
    %c1_27 = arith.constant 1 : index
    %c1_28 = arith.constant 1 : index
    %c0_29 = arith.constant 0 : index
    %29 = vector.load %arg13[%c1_27, %c1_28, %c0_29] : memref<8x16x12xf32, #tpu.memory_space<vmem>>, vector<1x15x4xf32>
    tpu.vector_store %arg13[%c1_27, %c1_28, %c0_29], %28 {strides = array<i32>} : memref<8x16x12xf32, #tpu.memory_space<vmem>>, vector<1x15x4xf32>,
    %30 = vector.extract_strided_slice %26 {offsets = [0, 1, 0], sizes = [1, 15, 4], strides = [1, 1, 1]} : vector<1x16x4xf32> to vector<1x15x4xf32>
    %c1_30 = arith.constant 1 : index
    %c0_31 = arith.constant 0 : index
    %c8_32 = arith.constant 8 : index
    %31 = vector.load %arg13[%c1_30, %c0_31, %c8_32] : memref<8x16x12xf32, #tpu.memory_space<vmem>>, vector<1x15x4xf32>
    tpu.vector_store %arg13[%c1_30, %c0_31, %c8_32], %30 {strides = array<i32>} : memref<8x16x12xf32, #tpu.memory_space<vmem>>, vector<1x15x4xf32>,
    %c0_33 = arith.constant 0 : index
    %c0_34 = arith.constant 0 : index
    %c0_35 = arith.constant 0 : index
    %c0_36 = arith.constant 0 : index
    %32 = vector.load %arg2[%c0_33, %c0_34, %c0_35, %c0_36] : memref<1x4x16x4xf32, #tpu.memory_space<vmem>>, vector<1x4x16x4xf32>
    %33 = vector.shape_cast %32 : vector<1x4x16x4xf32> to vector<4x16x4xf32>
    %c2 = arith.constant 2 : index
    %c0_37 = arith.constant 0 : index
    %c4_38 = arith.constant 4 : index
    %34 = vector.load %arg13[%c2, %c0_37, %c4_38] : memref<8x16x12xf32, #tpu.memory_space<vmem>>, vector<4x16x4xf32>
    tpu.vector_store %arg13[%c2, %c0_37, %c4_38], %33 {strides = array<i32>} : memref<8x16x12xf32, #tpu.memory_space<vmem>>, vector<4x16x4xf32>,
    %35 = vector.extract_strided_slice %33 {offsets = [0, 0, 0], sizes = [4, 15, 4], strides = [1, 1, 1]} : vector<4x16x4xf32> to vector<4x15x4xf32>
    %c2_39 = arith.constant 2 : index
    %c1_40 = arith.constant 1 : index
    %c0_41 = arith.constant 0 : index
    %36 = vector.load %arg13[%c2_39, %c1_40, %c0_41] : memref<8x16x12xf32, #tpu.memory_space<vmem>>, vector<4x15x4xf32>
    tpu.vector_store %arg13[%c2_39, %c1_40, %c0_41], %35 {strides = array<i32>} : memref<8x16x12xf32, #tpu.memory_space<vmem>>, vector<4x15x4xf32>,
    %37 = vector.extract_strided_slice %33 {offsets = [0, 1, 0], sizes = [4, 15, 4], strides = [1, 1, 1]} : vector<4x16x4xf32> to vector<4x15x4xf32>
    %c2_42 = arith.constant 2 : index
    %c0_43 = arith.constant 0 : index
    %c8_44 = arith.constant 8 : index
    %38 = vector.load %arg13[%c2_42, %c0_43, %c8_44] : memref<8x16x12xf32, #tpu.memory_space<vmem>>, vector<4x15x4xf32>
    tpu.vector_store %arg13[%c2_42, %c0_43, %c8_44], %37 {strides = array<i32>} : memref<8x16x12xf32, #tpu.memory_space<vmem>>, vector<4x15x4xf32>,
    %c1_i32_45 = arith.constant 1 : i32
    %39 = arith.addi %arg1, %c1_i32_45 : i32
    %c4_i32_46 = arith.constant 4 : i32
    %40 = arith.muli %39, %c4_i32_46 : i32
    %c0_47 = arith.constant 0 : index
    %c0_48 = arith.constant 0 : index
    %c0_49 = arith.constant 0 : index
    %c0_50 = arith.constant 0 : index
    %41 = vector.load %arg5[%c0_47, %c0_48, %c0_49, %c0_50] : memref<1x1x16x4xf32, #tpu.memory_space<vmem>>, vector<1x1x16x4xf32>
    %42 = vector.shape_cast %41 : vector<1x1x16x4xf32> to vector<1x16x4xf32>
    %c0_i32_51 = arith.constant 0 : i32
    %43 = arith.cmpi slt, %40, %c0_i32_51 : i32
    %c16_i32_52 = arith.constant 16 : i32
    %44 = arith.cmpi sge, %40, %c16_i32_52 : i32
    %45 = arith.ori %43, %44 : i1
    %cst_53 = arith.constant 0.000000e+00 : f32
    %46 = vector.broadcast %cst_53 : f32 to vector<1x16x4xf32>
    %47 = arith.select %45, %46, %42 : vector<1x16x4xf32>
    %c6 = arith.constant 6 : index
    %c0_54 = arith.constant 0 : index
    %c4_55 = arith.constant 4 : index
    %48 = vector.load %arg13[%c6, %c0_54, %c4_55] : memref<8x16x12xf32, #tpu.memory_space<vmem>>, vector<1x16x4xf32>
    tpu.vector_store %arg13[%c6, %c0_54, %c4_55], %47 {strides = array<i32>} : memref<8x16x12xf32, #tpu.memory_space<vmem>>, vector<1x16x4xf32>,
    %49 = vector.extract_strided_slice %47 {offsets = [0, 0, 0], sizes = [1, 15, 4], strides = [1, 1, 1]} : vector<1x16x4xf32> to vector<1x15x4xf32>
    %c6_56 = arith.constant 6 : index
    %c1_57 = arith.constant 1 : index
    %c0_58 = arith.constant 0 : index
    %50 = vector.load %arg13[%c6_56, %c1_57, %c0_58] : memref<8x16x12xf32, #tpu.memory_space<vmem>>, vector<1x15x4xf32>
    tpu.vector_store %arg13[%c6_56, %c1_57, %c0_58], %49 {strides = array<i32>} : memref<8x16x12xf32, #tpu.memory_space<vmem>>, vector<1x15x4xf32>,
    %51 = vector.extract_strided_slice %47 {offsets = [0, 1, 0], sizes = [1, 15, 4], strides = [1, 1, 1]} : vector<1x16x4xf32> to vector<1x15x4xf32>
    %c6_59 = arith.constant 6 : index
    %c0_60 = arith.constant 0 : index
    %c8_61 = arith.constant 8 : index
    %52 = vector.load %arg13[%c6_59, %c0_60, %c8_61] : memref<8x16x12xf32, #tpu.memory_space<vmem>>, vector<1x15x4xf32>
    tpu.vector_store %arg13[%c6_59, %c0_60, %c8_61], %51 {strides = array<i32>} : memref<8x16x12xf32, #tpu.memory_space<vmem>>, vector<1x15x4xf32>,
    %c1_i32_62 = arith.constant 1 : i32
    %53 = arith.addi %arg1, %c1_i32_62 : i32
    %c4_i32_63 = arith.constant 4 : i32
    %54 = arith.muli %53, %c4_i32_63 : i32
    %c1_i32_64 = arith.constant 1 : i32
    %55 = arith.addi %54, %c1_i32_64 : i32
    %c0_65 = arith.constant 0 : index
    %c0_66 = arith.constant 0 : index
    %c0_67 = arith.constant 0 : index
    %c0_68 = arith.constant 0 : index
    %56 = vector.load %arg6[%c0_65, %c0_66, %c0_67, %c0_68] : memref<1x1x16x4xf32, #tpu.memory_space<vmem>>, vector<1x1x16x4xf32>
    %57 = vector.shape_cast %56 : vector<1x1x16x4xf32> to vector<1x16x4xf32>
    %c0_i32_69 = arith.constant 0 : i32
    %58 = arith.cmpi slt, %55, %c0_i32_69 : i32
    %c16_i32_70 = arith.constant 16 : i32
    %59 = arith.cmpi sge, %55, %c16_i32_70 : i32
    %60 = arith.ori %58, %59 : i1
    %cst_71 = arith.constant 0.000000e+00 : f32
    %61 = vector.broadcast %cst_71 : f32 to vector<1x16x4xf32>
    %62 = arith.select %60, %61, %57 : vector<1x16x4xf32>
    %c7 = arith.constant 7 : index
    %c0_72 = arith.constant 0 : index
    %c4_73 = arith.constant 4 : index
    %63 = vector.load %arg13[%c7, %c0_72, %c4_73] : memref<8x16x12xf32, #tpu.memory_space<vmem>>, vector<1x16x4xf32>
    tpu.vector_store %arg13[%c7, %c0_72, %c4_73], %62 {strides = array<i32>} : memref<8x16x12xf32, #tpu.memory_space<vmem>>, vector<1x16x4xf32>,
    %64 = vector.extract_strided_slice %62 {offsets = [0, 0, 0], sizes = [1, 15, 4], strides = [1, 1, 1]} : vector<1x16x4xf32> to vector<1x15x4xf32>
    %c7_74 = arith.constant 7 : index
    %c1_75 = arith.constant 1 : index
    %c0_76 = arith.constant 0 : index
    %65 = vector.load %arg13[%c7_74, %c1_75, %c0_76] : memref<8x16x12xf32, #tpu.memory_space<vmem>>, vector<1x15x4xf32>
    tpu.vector_store %arg13[%c7_74, %c1_75, %c0_76], %64 {strides = array<i32>} : memref<8x16x12xf32, #tpu.memory_space<vmem>>, vector<1x15x4xf32>,
    %66 = vector.extract_strided_slice %62 {offsets = [0, 1, 0], sizes = [1, 15, 4], strides = [1, 1, 1]} : vector<1x16x4xf32> to vector<1x15x4xf32>
    %c7_77 = arith.constant 7 : index
    %c0_78 = arith.constant 0 : index
    %c8_79 = arith.constant 8 : index
    %67 = vector.load %arg13[%c7_77, %c0_78, %c8_79] : memref<8x16x12xf32, #tpu.memory_space<vmem>>, vector<1x15x4xf32>
    tpu.vector_store %arg13[%c7_77, %c0_78, %c8_79], %66 {strides = array<i32>} : memref<8x16x12xf32, #tpu.memory_space<vmem>>, vector<1x15x4xf32>,
    %c0_80 = arith.constant 0 : index
    %c0_81 = arith.constant 0 : index
    %68 = vector.load %arg8[%c0_80, %c0_81] : memref<1x32xf32, #tpu.memory_space<vmem>>, vector<1x32xf32>
    %69 = vector.shape_cast %68 : vector<1x32xf32> to vector<1x32xf32>
    %70 = vector.broadcast %69 : vector<1x32xf32> to vector<96x32xf32>
    %c0_82 = arith.constant 0 : index
    %c0_83 = arith.constant 0 : index
    %c0_84 = arith.constant 0 : index
    %71 = vector.load %arg13[%c0_82, %c0_83, %c0_84] : memref<8x16x12xf32, #tpu.memory_space<vmem>>, vector<6x16x12xf32>
    %72 = vector.shape_cast %71 : vector<6x16x12xf32> to vector<96x12xf32>
    %c0_85 = arith.constant 0 : index
    %c0_86 = arith.constant 0 : index
    %c0_87 = arith.constant 0 : index
    %73 = vector.load %arg7[%c0_85, %c0_86, %c0_87] : memref<3x12x32xf32, #tpu.memory_space<vmem>>, vector<1x12x32xf32>
    %74 = vector.shape_cast %73 : vector<1x12x32xf32> to vector<12x32xf32>
    %cst_88 = arith.constant dense<0.000000e+00> : vector<96x32xf32>
    %75 = tpu.matmul %72, %74, %cst_88 {dimension_numbers = #tpu.dot_dimension_numbers<[1], [0], [0], [1], [0, 0, 1, 1], [], []>} : vector<96x12xf32>, vector<12x32xf32>, vector<96x32xf32> -> vector<96x32xf32>
    %76 = arith.addf %70, %75 : vector<96x32xf32>
    %c1_89 = arith.constant 1 : index
    %c0_90 = arith.constant 0 : index
    %c0_91 = arith.constant 0 : index
    %77 = vector.load %arg13[%c1_89, %c0_90, %c0_91] : memref<8x16x12xf32, #tpu.memory_space<vmem>>, vector<6x16x12xf32>
    %78 = vector.shape_cast %77 : vector<6x16x12xf32> to vector<96x12xf32>
    %c1_92 = arith.constant 1 : index
    %c0_93 = arith.constant 0 : index
    %c0_94 = arith.constant 0 : index
    %79 = vector.load %arg7[%c1_92, %c0_93, %c0_94] : memref<3x12x32xf32, #tpu.memory_space<vmem>>, vector<1x12x32xf32>
    %80 = vector.shape_cast %79 : vector<1x12x32xf32> to vector<12x32xf32>
    %cst_95 = arith.constant dense<0.000000e+00> : vector<96x32xf32>
    %81 = tpu.matmul %78, %80, %cst_95 {dimension_numbers = #tpu.dot_dimension_numbers<[1], [0], [0], [1], [0, 0, 1, 1], [], []>} : vector<96x12xf32>, vector<12x32xf32>, vector<96x32xf32> -> vector<96x32xf32>
    %82 = arith.addf %76, %81 : vector<96x32xf32>
    %c2_96 = arith.constant 2 : index
    %c0_97 = arith.constant 0 : index
    %c0_98 = arith.constant 0 : index
    %83 = vector.load %arg13[%c2_96, %c0_97, %c0_98] : memref<8x16x12xf32, #tpu.memory_space<vmem>>, vector<6x16x12xf32>
    %84 = vector.shape_cast %83 : vector<6x16x12xf32> to vector<96x12xf32>
    %c2_99 = arith.constant 2 : index
    %c0_100 = arith.constant 0 : index
    %c0_101 = arith.constant 0 : index
    %85 = vector.load %arg7[%c2_99, %c0_100, %c0_101] : memref<3x12x32xf32, #tpu.memory_space<vmem>>, vector<1x12x32xf32>
    %86 = vector.shape_cast %85 : vector<1x12x32xf32> to vector<12x32xf32>
    %cst_102 = arith.constant dense<0.000000e+00> : vector<96x32xf32>
    %87 = tpu.matmul %84, %86, %cst_102 {dimension_numbers = #tpu.dot_dimension_numbers<[1], [0], [0], [1], [0, 0, 1, 1], [], []>} : vector<96x12xf32>, vector<12x32xf32>, vector<96x32xf32> -> vector<96x32xf32>
    %88 = arith.addf %82, %87 : vector<96x32xf32>
    %c0_103 = arith.constant 0 : index
    %89 = memref.load %arg9[%c0_103] : memref<1xf32, #tpu.memory_space<smem>>
    %cst_104 = arith.constant 0.000000e+00 : f32
    %90 = vector.broadcast %cst_104 : f32 to vector<96x32xf32>
    %91 = arith.cmpf oge, %88, %90 : vector<96x32xf32>
    %92 = vector.broadcast %89 : f32 to vector<96x32xf32>
    %93 = arith.mulf %92, %88 : vector<96x32xf32>
    %94 = arith.select %91, %88, %93 : vector<96x32xi1>, vector<96x32xf32>
    %cst_105 = arith.constant 0.000000e+00 : f32
    %95 = vector.broadcast %cst_105 : f32 to vector<6x1x32xf32>
    %c0_106 = arith.constant 0 : index
    %c0_107 = arith.constant 0 : index
    %c0_108 = arith.constant 0 : index
    %96 = vector.load %arg14[%c0_106, %c0_107, %c0_108] : memref<6x16x96xf32, #tpu.memory_space<vmem>>, vector<6x1x32xf32>
    tpu.vector_store %arg14[%c0_106, %c0_107, %c0_108], %95 {strides = array<i32>} : memref<6x16x96xf32, #tpu.memory_space<vmem>>, vector<6x1x32xf32>,
    %cst_109 = arith.constant 0.000000e+00 : f32
    %97 = vector.broadcast %cst_109 : f32 to vector<6x1x32xf32>
    %c0_110 = arith.constant 0 : index
    %c15_111 = arith.constant 15 : index
    %c64 = arith.constant 64 : index
    %98 = vector.load %arg14[%c0_110, %c15_111, %c64] : memref<6x16x96xf32, #tpu.memory_space<vmem>>, vector<6x1x32xf32>
    tpu.vector_store %arg14[%c0_110, %c15_111, %c64], %97 {strides = array<i32>} : memref<6x16x96xf32, #tpu.memory_space<vmem>>, vector<6x1x32xf32>,
    %99 = vector.shape_cast %94 : vector<96x32xf32> to vector<6x16x32xf32>
    %c0_112 = arith.constant 0 : index
    %c0_113 = arith.constant 0 : index
    %c32 = arith.constant 32 : index
    %100 = vector.load %arg14[%c0_112, %c0_113, %c32] : memref<6x16x96xf32, #tpu.memory_space<vmem>>, vector<6x16x32xf32>
    tpu.vector_store %arg14[%c0_112, %c0_113, %c32], %99 {strides = array<i32>} : memref<6x16x96xf32, #tpu.memory_space<vmem>>, vector<6x16x32xf32>,
    %101 = vector.extract_strided_slice %99 {offsets = [0, 0, 0], sizes = [6, 15, 32], strides = [1, 1, 1]} : vector<6x16x32xf32> to vector<6x15x32xf32>
    %c0_114 = arith.constant 0 : index
    %c1_115 = arith.constant 1 : index
    %c0_116 = arith.constant 0 : index
    %102 = vector.load %arg14[%c0_114, %c1_115, %c0_116] : memref<6x16x96xf32, #tpu.memory_space<vmem>>, vector<6x15x32xf32>
    tpu.vector_store %arg14[%c0_114, %c1_115, %c0_116], %101 {strides = array<i32>} : memref<6x16x96xf32, #tpu.memory_space<vmem>>, vector<6x15x32xf32>,
    %103 = vector.extract_strided_slice %99 {offsets = [0, 1, 0], sizes = [6, 15, 32], strides = [1, 1, 1]} : vector<6x16x32xf32> to vector<6x15x32xf32>
    %c0_117 = arith.constant 0 : index
    %c0_118 = arith.constant 0 : index
    %c64_119 = arith.constant 64 : index
    %104 = vector.load %arg14[%c0_117, %c0_118, %c64_119] : memref<6x16x96xf32, #tpu.memory_space<vmem>>, vector<6x15x32xf32>
    tpu.vector_store %arg14[%c0_117, %c0_118, %c64_119], %103 {strides = array<i32>} : memref<6x16x96xf32, #tpu.memory_space<vmem>>, vector<6x15x32xf32>,
    %c0_i32_120 = arith.constant 0 : i32
    %105 = arith.cmpi eq, %arg1, %c0_i32_120 : i32
    %106 = arith.extui %105 : i1 to i32
    %c0_i32_121 = arith.constant 0 : i32
    %107 = arith.cmpi ne, %106, %c0_i32_121 : i32
    scf.if %107 {
      %cst_150 = arith.constant 0.000000e+00 : f32
      %136 = vector.broadcast %cst_150 : f32 to vector<1x16x96xf32>
      %c0_151 = arith.constant 0 : index
      %c0_152 = arith.constant 0 : index
      %c0_153 = arith.constant 0 : index
      %137 = vector.load %arg14[%c0_151, %c0_152, %c0_153] : memref<6x16x96xf32, #tpu.memory_space<vmem>>, vector<1x16x96xf32>
      tpu.vector_store %arg14[%c0_151, %c0_152, %c0_153], %136 {strides = array<i32>} : memref<6x16x96xf32, #tpu.memory_space<vmem>>, vector<1x16x96xf32>,
    } else {
    }
    %c3_i32 = arith.constant 3 : i32
    %108 = arith.cmpi eq, %arg1, %c3_i32 : i32
    %109 = arith.extui %108 : i1 to i32
    %c0_i32_122 = arith.constant 0 : i32
    %110 = arith.cmpi ne, %109, %c0_i32_122 : i32
    scf.if %110 {
      %cst_150 = arith.constant 0.000000e+00 : f32
      %136 = vector.broadcast %cst_150 : f32 to vector<1x16x96xf32>
      %c5 = arith.constant 5 : index
      %c0_151 = arith.constant 0 : index
      %c0_152 = arith.constant 0 : index
      %137 = vector.load %arg14[%c5, %c0_151, %c0_152] : memref<6x16x96xf32, #tpu.memory_space<vmem>>, vector<1x16x96xf32>
      tpu.vector_store %arg14[%c5, %c0_151, %c0_152], %136 {strides = array<i32>} : memref<6x16x96xf32, #tpu.memory_space<vmem>>, vector<1x16x96xf32>,
    } else {
    }
    %c0_123 = arith.constant 0 : index
    %c0_124 = arith.constant 0 : index
    %111 = vector.load %arg11[%c0_123, %c0_124] : memref<1x32xf32, #tpu.memory_space<vmem>>, vector<1x32xf32>
    %112 = vector.shape_cast %111 : vector<1x32xf32> to vector<1x32xf32>
    %113 = vector.broadcast %112 : vector<1x32xf32> to vector<64x32xf32>
    %c0_125 = arith.constant 0 : index
    %c0_126 = arith.constant 0 : index
    %c0_127 = arith.constant 0 : index
    %114 = vector.load %arg14[%c0_125, %c0_126, %c0_127] : memref<6x16x96xf32, #tpu.memory_space<vmem>>, vector<4x16x96xf32>
    %115 = vector.shape_cast %114 : vector<4x16x96xf32> to vector<64x96xf32>
    %c0_128 = arith.constant 0 : index
    %c0_129 = arith.constant 0 : index
    %c0_130 = arith.constant 0 : index
    %116 = vector.load %arg10[%c0_128, %c0_129, %c0_130] : memref<3x96x32xf32, #tpu.memory_space<vmem>>, vector<1x96x32xf32>
    %117 = vector.shape_cast %116 : vector<1x96x32xf32> to vector<96x32xf32>
    %cst_131 = arith.constant dense<0.000000e+00> : vector<64x32xf32>
    %118 = tpu.matmul %115, %117, %cst_131 {dimension_numbers = #tpu.dot_dimension_numbers<[1], [0], [0], [1], [0, 0, 1, 1], [], []>} : vector<64x96xf32>, vector<96x32xf32>, vector<64x32xf32> -> vector<64x32xf32>
    %119 = arith.addf %113, %118 : vector<64x32xf32>
    %c1_132 = arith.constant 1 : index
    %c0_133 = arith.constant 0 : index
    %c0_134 = arith.constant 0 : index
    %120 = vector.load %arg14[%c1_132, %c0_133, %c0_134] : memref<6x16x96xf32, #tpu.memory_space<vmem>>, vector<4x16x96xf32>
    %121 = vector.shape_cast %120 : vector<4x16x96xf32> to vector<64x96xf32>
    %c1_135 = arith.constant 1 : index
    %c0_136 = arith.constant 0 : index
    %c0_137 = arith.constant 0 : index
    %122 = vector.load %arg10[%c1_135, %c0_136, %c0_137] : memref<3x96x32xf32, #tpu.memory_space<vmem>>, vector<1x96x32xf32>
    %123 = vector.shape_cast %122 : vector<1x96x32xf32> to vector<96x32xf32>
    %cst_138 = arith.constant dense<0.000000e+00> : vector<64x32xf32>
    %124 = tpu.matmul %121, %123, %cst_138 {dimension_numbers = #tpu.dot_dimension_numbers<[1], [0], [0], [1], [0, 0, 1, 1], [], []>} : vector<64x96xf32>, vector<96x32xf32>, vector<64x32xf32> -> vector<64x32xf32>
    %125 = arith.addf %119, %124 : vector<64x32xf32>
    %c2_139 = arith.constant 2 : index
    %c0_140 = arith.constant 0 : index
    %c0_141 = arith.constant 0 : index
    %126 = vector.load %arg14[%c2_139, %c0_140, %c0_141] : memref<6x16x96xf32, #tpu.memory_space<vmem>>, vector<4x16x96xf32>
    %127 = vector.shape_cast %126 : vector<4x16x96xf32> to vector<64x96xf32>
    %c2_142 = arith.constant 2 : index
    %c0_143 = arith.constant 0 : index
    %c0_144 = arith.constant 0 : index
    %128 = vector.load %arg10[%c2_142, %c0_143, %c0_144] : memref<3x96x32xf32, #tpu.memory_space<vmem>>, vector<1x96x32xf32>
    %129 = vector.shape_cast %128 : vector<1x96x32xf32> to vector<96x32xf32>
    %cst_145 = arith.constant dense<0.000000e+00> : vector<64x32xf32>
    %130 = tpu.matmul %127, %129, %cst_145 {dimension_numbers = #tpu.dot_dimension_numbers<[1], [0], [0], [1], [0, 0, 1, 1], [], []>} : vector<64x96xf32>, vector<96x32xf32>, vector<64x32xf32> -> vector<64x32xf32>
    %131 = arith.addf %125, %130 : vector<64x32xf32>
    %132 = vector.shape_cast %131 : vector<64x32xf32> to vector<4x16x32xf32>
    %c0_146 = arith.constant 0 : index
    %c0_147 = arith.constant 0 : index
    %c0_148 = arith.constant 0 : index
    %c0_149 = arith.constant 0 : index
    %133 = vector.load %arg12[%c0_146, %c0_147, %c0_148, %c0_149] : memref<1x4x16x32xf32, #tpu.memory_space<vmem>>, vector<1x4x16x32xf32>
    %134 = vector.shape_cast %133 : vector<1x4x16x32xf32> to vector<4x16x32xf32>
    %135 = vector.shape_cast %132 : vector<4x16x32xf32> to vector<1x4x16x32xf32>
    tpu.vector_store %arg12[%c0_146, %c0_147, %c0_148, %c0_149], %135 {strides = array<i32>} : memref<1x4x16x32xf32, #tpu.memory_space<vmem>>, vector<1x4x16x32xf32>,
    return
  }
  func.func @transform_0(%arg0: i32, %arg1: i32) -> (i32, i32, i32, i32) {
    %c0_i32 = arith.constant 0 : i32
    %c0_i32_0 = arith.constant 0 : i32
    %c0_i32_1 = arith.constant 0 : i32
    return %arg0, %arg1, %c0_i32, %c0_i32_0 : i32, i32, i32, i32
  }
  func.func @transform_1(%arg0: i32, %arg1: i32) -> (i32, i32, i32, i32) {
    %c4_i32 = arith.constant 4 : i32
    %0 = arith.muli %arg1, %c4_i32 : i32
    %c2_i32 = arith.constant 2 : i32
    %1 = arith.subi %0, %c2_i32 : i32
    %c0_i32 = arith.constant 0 : i32
    %2 = arith.maxsi %1, %c0_i32 : i32
    %c0_i32_0 = arith.constant 0 : i32
    %c0_i32_1 = arith.constant 0 : i32
    %c0_i32_2 = arith.constant 0 : i32
    return %arg0, %2, %c0_i32_0, %c0_i32_1 : i32, i32, i32, i32
  }
  func.func @transform_2(%arg0: i32, %arg1: i32) -> (i32, i32, i32, i32) {
    %c4_i32 = arith.constant 4 : i32
    %0 = arith.muli %arg1, %c4_i32 : i32
    %c1_i32 = arith.constant 1 : i32
    %1 = arith.subi %0, %c1_i32 : i32
    %c0_i32 = arith.constant 0 : i32
    %2 = arith.maxsi %1, %c0_i32 : i32
    %c0_i32_0 = arith.constant 0 : i32
    %c0_i32_1 = arith.constant 0 : i32
    %c0_i32_2 = arith.constant 0 : i32
    return %arg0, %2, %c0_i32_0, %c0_i32_1 : i32, i32, i32, i32
  }
  func.func @transform_3(%arg0: i32, %arg1: i32) -> (i32, i32, i32, i32) {
    %c1_i32 = arith.constant 1 : i32
    %0 = arith.addi %arg1, %c1_i32 : i32
    %c4_i32 = arith.constant 4 : i32
    %1 = arith.muli %0, %c4_i32 : i32
    %c15_i32 = arith.constant 15 : i32
    %2 = arith.minsi %1, %c15_i32 : i32
    %c0_i32 = arith.constant 0 : i32
    %c0_i32_0 = arith.constant 0 : i32
    %c0_i32_1 = arith.constant 0 : i32
    return %arg0, %2, %c0_i32, %c0_i32_0 : i32, i32, i32, i32
  }
  func.func @transform_4(%arg0: i32, %arg1: i32) -> (i32, i32, i32, i32) {
    %c1_i32 = arith.constant 1 : i32
    %0 = arith.addi %arg1, %c1_i32 : i32
    %c4_i32 = arith.constant 4 : i32
    %1 = arith.muli %0, %c4_i32 : i32
    %c1_i32_0 = arith.constant 1 : i32
    %2 = arith.addi %1, %c1_i32_0 : i32
    %c15_i32 = arith.constant 15 : i32
    %3 = arith.minsi %2, %c15_i32 : i32
    %c0_i32 = arith.constant 0 : i32
    %c0_i32_1 = arith.constant 0 : i32
    %c0_i32_2 = arith.constant 0 : i32
    return %arg0, %3, %c0_i32, %c0_i32_1 : i32, i32, i32, i32
  }
  func.func @transform_5(%arg0: i32, %arg1: i32) -> (i32, i32, i32) {
    %c0_i32 = arith.constant 0 : i32
    %c0_i32_0 = arith.constant 0 : i32
    %c0_i32_1 = arith.constant 0 : i32
    %c0_i32_2 = arith.constant 0 : i32
    return %c0_i32, %c0_i32_0, %c0_i32_1 : i32, i32, i32
  }
  func.func @transform_6(%arg0: i32, %arg1: i32) -> (i32, i32) {
    %c0_i32 = arith.constant 0 : i32
    %c0_i32_0 = arith.constant 0 : i32
    %c0_i32_1 = arith.constant 0 : i32
    return %c0_i32, %c0_i32_0 : i32, i32
  }
  func.func @transform_7(%arg0: i32, %arg1: i32) -> i32 {
    %c0_i32 = arith.constant 0 : i32
    %c0_i32_0 = arith.constant 0 : i32
    return %c0_i32 : i32
  }
  func.func @transform_8(%arg0: i32, %arg1: i32) -> (i32, i32, i32) {
    %c0_i32 = arith.constant 0 : i32
    %c0_i32_0 = arith.constant 0 : i32
    %c0_i32_1 = arith.constant 0 : i32
    %c0_i32_2 = arith.constant 0 : i32
    return %c0_i32, %c0_i32_0, %c0_i32_1 : i32, i32, i32
  }
  func.func @transform_9(%arg0: i32, %arg1: i32) -> (i32, i32) {
    %c0_i32 = arith.constant 0 : i32
    %c0_i32_0 = arith.constant 0 : i32
    %c0_i32_1 = arith.constant 0 : i32
    return %c0_i32, %c0_i32_0 : i32, i32
  }
  func.func @transform_10(%arg0: i32, %arg1: i32) -> (i32, i32, i32, i32) {
    %c0_i32 = arith.constant 0 : i32
    %c0_i32_0 = arith.constant 0 : i32
    %c0_i32_1 = arith.constant 0 : i32
    return %arg0, %arg1, %c0_i32, %c0_i32_0 : i32, i32, i32, i32
  }
}

</mosaic_0001>

<bundles_post_ra>
// kernel: tpu_custom_call.1
= control target key start
LH: loop header
LB: loop body
LE: loop exit
PB: predicated region body
PF: predicated region fallthrough
CT: control target
= control target key end

     0   :  { %s5208_s0 = inlined_call_operand.hbm [shape: f32[2,16,16,4], index: 0, kind: input, shape index: {}]   ;;  %s5209_s1 = inlined_call_operand.hbm [shape: f32[2,16,16,4], index: 1, kind: input, shape index: {}]   ;;  %s5210_s2 = inlined_call_operand.hbm [shape: f32[2,16,16,4], index: 2, kind: input, shape index: {}]   ;;  %s5211_s3 = inlined_call_operand.hbm [shape: f32[2,16,16,4], index: 3, kind: input, shape index: {}]   ;;  %s5212_s4 = inlined_call_operand.hbm [shape: f32[2,16,16,4], index: 4, kind: input, shape index: {}]   ;;  %s5213_s5 = inlined_call_operand.hbm [shape: f32[3,12,32], index: 5, kind: input, shape index: {}]   ;;  %s5214_s6 = inlined_call_operand.hbm [shape: f32[1,32], index: 6, kind: input, shape index: {}]   ;;  %s5215_s7 = inlined_call_operand.<no memory space> [shape: f32[1], index: 7, kind: input, shape index: {}]   ;;  %s5216_s8 = inlined_call_operand.hbm [shape: f32[3,96,32], index: 8, kind: input, shape index: {}]   ;;  %s5217_s9 = inlined_call_operand.hbm [shape: f32[1,32], index: 9, kind: input, shape index: {}]   ;;  %s5218_s10 = inlined_call_operand.hbm [shape: f32[2,16,16,32], index: 10, kind: output, shape index: {}]  }
   0x1   :  { %5263 = sst [smem:[#allocation53_spill]] %s5208_s0 }
   0x2   :  { %5264 = sst [smem:[#allocation54_spill]] %s5209_s1 }
   0x3   :  { %5265 = sst [smem:[#allocation55_spill]] %s5210_s2 }
   0x4   :  { %5266 = sst [smem:[#allocation56_spill]] %s5211_s3 }
   0x5   :  { %5267 = sst [smem:[#allocation57_spill]] %s5212_s4 }
   0x6   :  { %5268 = sst [smem:[#allocation58_spill]] %s5213_s5 }
   0x7   :  { %5269 = sst [smem:[#allocation59_spill]] %s5214_s6 }
   0x8   :  { %5270 = sst [smem:[#allocation60_spill]] %s5216_s8 }
   0x9   :  { %5271 = sst [smem:[#allocation61_spill]] %s5217_s9 }
   0xa   :  { %5272 = sst [smem:[#allocation62_spill]] %s5218_s10 }
   0xb   :  { %15 = sst [smem:[#allocation4]] %s5215_s7 }
   0xc   :  { %16 = vsyncpa [#allocation6], 0 }
   0xd   :  { %18 = vsyncpa [#allocation6 + $0x1], 0 }
   0xe   :  { %19 = vsyncpa [#allocation9], 0 }
   0xf   :  { %21 = vsyncpa [#allocation9 + $0x1], 0 }
  0x10   :  { %22 = vsyncpa [#allocation12], 0 }
  0x11   :  { %24 = vsyncpa [#allocation12 + $0x1], 0 }
  0x12   :  { %25 = vsyncpa [#allocation15], 0 }
  0x13   :  { %26 = vsyncpa [#allocation18], 0 }
  0x14   :  { %27 = vsyncpa [#allocation7], 0 }
  0x15   :  { %29 = vsyncpa [#allocation7 + $0x1], 0  ;;  %s3861_s15 = smov 0   ;;  %s3863_s16 = smov 0  }
  0x16   :  { %s3865_s17 = smov 0   ;;  %s3867_s18 = smov 0  }
  0x17   :  { %s3869_s19 = smov 0   ;;  %s3871_s7 = smov 0  }
  0x18   :  { %s3873_s20 = smov 0   ;;  %s3875_s21 = smov 0  }
  0x19   :  { %s3877_s22 = smov 0   ;;  %s3879_s23 = smov 0  }
  0x1a   :  { %s3881_s24 = smov 0   ;;  %s3883_s25 = smov 0  }
  0x1b   :  { %s3885_s26 = smov 0   ;;  %s3887_s27 = smov 0  }
  0x1c   :  { %s3889_s28 = smov 0   ;;  %s3891_s29 = smov 0  }
  0x1d   :  { %s3893_s30 = smov 0   ;;  %s3895_s11 = smov 0  }
  0x1e   :  { %s3897_s12 = smov 0   ;;  %s3899_s13 = smov 0  }
  0x1f LB: > { %5273 = sst [smem:[#allocation29_spill]] %s3704_s15  ;;  %s3962_s14 = sadd.s32 4294967295, %s3780_s13   ;;  %s3780_s13 = sphi %s3899_s13, %s35_s13   ;;  %s3776_s12 = sphi %s3897_s12, %s5418_s12   ;;  %s3772_s11 = sphi %s3895_s11, %s5417_s11   ;;  %s3768_s30 = sphi %s3893_s30, %s5407_s30   ;;  %s3764_s29 = sphi %s3891_s29, %s5405_s29   ;;  %s3760_s28 = sphi %s3889_s28, %s5416_s28   ;;  %s3756_s27 = sphi %s3887_s27, %s5415_s27   ;;  %s3752_s26 = sphi %s3885_s26, %s5414_s26   ;;  %s3748_s25 = sphi %s3883_s25, %s5401_s25   ;;  %s3744_s24 = sphi %s3881_s24, %s5400_s24   ;;  %s3740_s23 = sphi %s3879_s23, %s5399_s23   ;;  %s3736_s22 = sphi %s3877_s22, %s5413_s22   ;;  %s3732_s21 = sphi %s3875_s21, %s5398_s21   ;;  %s3728_s20 = sphi %s3873_s20, %s5397_s20   ;;  %s3724_s7 = sphi %s3871_s7, %s5396_s7   ;;  %s3720_s19 = sphi %s3869_s19, %s5412_s19   ;;  %s3716_s18 = sphi %s3867_s18, %s5411_s18   ;;  %s3712_s17 = sphi %s3865_s17, %s5409_s17   ;;  %s3708_s16 = sphi %s3863_s16, %s5393_s16   ;;  %s3704_s15 = sphi %s3861_s15, %s5406_s15  }
  0x20   : > { %5274 = sst [smem:[#allocation30_spill]] %s3708_s16  ;;  %p2454_p0 = scmp.ge.s32.totalorder %s3780_s13, 1 }
  0x21   : > { %5275 = sst [smem:[#allocation31_spill]] %s3712_s17  ;;  %p5228_p1 = scmp.eq.s32.totalorder %s3962_s14, 0 }
  0x22   : > { %5276 = sst [smem:[#allocation32_spill]] %s3724_s7  ;;  %p359_p2 = scmp.lt.s32.totalorder %s3780_s13, 9 }
  0x23   : > { %5277 = sst [smem:[#allocation33_spill]] %s3728_s20  ;;  %s3783_s15 = smov [#allocation17]  }
  0x24   : > { %5278 = sst [smem:[#allocation34_spill]] %s3732_s21  ;;  %p3967_p3 = pnand %p2454_p0, %p359_p2 }
  0x25   : > { %5279 = sst [smem:[#allocation35_spill]] %s3736_s22  ;;  %s398_s16 = sshll.u32 %s3783_s15, 4  ;;  %s3979_s16 = int_to_ptr.vmem [resolvable:$true] %s398_s16 }
  0x26   : > { %5280 = sst [smem:[#allocation36_spill]] %s3744_s24  ;;  %p3058_p4 = pneg %p3967_p3 }
  0x27   : > { %5281 = sst [smem:[#allocation37_spill]] %s3748_s25  ;;  %s5293_s5 = sld [smem:[#allocation58_spill]] }
  0x28   : > { %5282 = sst [smem:[#allocation38_spill]] %s3752_s26  ;;  %p3975_p5 = pnand %p3058_p4, %p5228_p1 }
  0x29   : > { %5283 = sst [smem:[#allocation39_spill]] %s3756_s27 }
  0x2a   : > { %5284 = sst [smem:[#allocation40_spill]] %s3760_s28  ;;  %p3989_p7 = pneg %p3975_p5 }
  0x2b   : > { %5285 = sst [smem:[#allocation41_spill]] %s3764_s29 }
  0x2c   : > { %5286 = sst [smem:[#allocation42_spill]] %s3768_s30  ;;  %s3782_s30 = smov [#allocation14]  }
  0x2d   : > { %5287 = sst [smem:[#allocation43_spill]] %s3772_s11  ;;  %s371_s29 = sshll.u32 %s3782_s30, 4  ;;  %s372_s29 = int_to_ptr.vmem [resolvable:$true] %s371_s29 }
  0x2e   : > { %5288 = sst [smem:[#allocation44_spill]] %s3776_s12  ;;  %s3300_s20 = scalar_lea.hbm %s5293_s5, 768 }
  0x2f   : > { %s5289_s10 = scalar_select %p3967_p3, 1, 0 }
  0x30   : > { %s5291_s4 = scalar_select %p3975_p5, 1, 0 }
  0x31   : > { %5290 = sst [smem:[#allocation45_spill]] %s5289_s10  ;;  %p3301_p6 = scmp.ne.s32.totalorder %s5293_s5, %s3300_s20 }
  0x32   : > { %5292 = sst [smem:[#allocation46_spill]] %s5291_s4  ;;  %p3307_p10 = scmp.lt.u32.totalorder %s3300_s20, %s5293_s5 }
  0x33   : > { %p3303_p8 = pnand %p3989_p7, %p3301_p6 }
  0x35   : > { %p3304_p9 = pneg %p3303_p8 }
  0x37   : > { %p3309_p11 = pnand %p3307_p10, %p3304_p9 }
  0x39   : > { %3312 = shalt.err (!%p3309_p11)
}
  0x3a   : > { %s3313_s2 = scalar_lea.vmem %s372_s29, 768  ;;  %p3321_p2 = scmp.lt.s32.totalorder %s372_s29, %s372_s29 }
  0x3b   : > { %p3314_p12 = scmp.ne.s32.totalorder %s372_s29, %s3313_s2  ;;  %p3322_p4 = scmp.lt.s32.totalorder %s3313_s2, %s3313_s2 }
  0x3d   : > { %p3316_p13 = pnand %p3314_p12, %p3989_p7  ;;  %p3323_p1 = por %p3322_p4, %p3321_p2 }
  0x3f   : > { %p3317_p0 = pneg %p3316_p13 }
  0x41   : > { %p3324_p3 = pnand %p3323_p1, %p3317_p0 }
  0x43   : > { %3327 = shalt.err (!%p3324_p3)
}
  0x44   : > { %s5233_s17 = smov 128   ;;  %s5235_s21 = smov 8  }
  0x45   : > { %3061 = dma.hbm_to_vmem [thread:$0]  (!%p3975_p5), %s5293_s5, 768, %s372_s29, [#allocation15], %s5233_s17, %s5233_s17, %s5235_s21  }
  0x46   : > { %s5295_s8 = sld [smem:[#allocation60_spill]] }
  0x4c   : > { %s3328_s0 = scalar_lea.hbm %s5295_s8, 4608 }
  0x4d   : > { %p3329_p1 = scmp.ne.s32.totalorder %s5295_s8, %s3328_s0  ;;  %p3335_p8 = scmp.lt.u32.totalorder %s3328_s0, %s5295_s8 }
  0x4f   : > { %p3331_p3 = pnand %p3329_p1, %p3989_p7 }
  0x51   : > { %p3332_p6 = pneg %p3331_p3 }
  0x53   : > { %p3337_p9 = pnand %p3335_p8, %p3332_p6 }
  0x55   : > { %3340 = shalt.err (!%p3337_p9)
}
  0x56   : > { %s3341_s29 = scalar_lea.vmem %s3979_s16, 4608  ;;  %p3349_p13 = scmp.lt.s32.totalorder %s3979_s16, %s3979_s16 }
  0x57   : > { %p3342_p10 = scmp.ne.s32.totalorder %s3979_s16, %s3341_s29  ;;  %p3350_p0 = scmp.lt.s32.totalorder %s3341_s29, %s3341_s29 }
  0x59   : > { %p3344_p11 = pnand %p3342_p10, %p3989_p7  ;;  %p3351_p2 = por %p3350_p0, %p3349_p13 }
  0x5b   : > { %p3345_p12 = pneg %p3344_p11 }
  0x5d   : > { %p3352_p4 = pnand %p3351_p2, %p3345_p12 }
  0x5f   : > { %3355 = shalt.err (!%p3352_p4)
}
  0x60   : > { %3067 = dma.hbm_to_vmem [thread:$0]  (!%p3975_p5), %s5295_s8, 4608, %s3979_s16, [#allocation18], %s5233_s17, %s5233_s17, %s5235_s21  }
  0x61   : > { %s44_s27 = sadd.s32 1, %s3772_s11  ;;  %s47_s28 = sadd.s32 1, %s3776_s12 }
  0x62   : > { %p45_p1 = scmp.ge.s32.totalorder %s44_s27, 4  ;;  %p5248_p3 = scmp.eq.s32.totalorder %s3780_s13, 0 }
  0x63   : > { %s4038_s10 = sshll.u32 %s3772_s11, 2  ;;  %s92_s20 = sadd.s32 1, %s3748_s25 }
  0x64   : > { %s5420_s27 = smov (%p45_p1, %s44_s27), 0  ;;  %s5422_s28 = smov (!%p45_p1, %s47_s28), %s3776_s12 }
  0x65   : > { %5296 = sst [smem:[#allocation47_spill]] %s5420_s27  ;;  %s2443_s22 = sadd.s32 4294967294, %s4038_s10 }
  0x66   : > { %s4046_s16 = sshll.u32 %s5420_s27, 2  ;;  %p49_p6 = scmp.ge.s32.totalorder %s5422_s28, 2 }
  0x67   : > { %p81_p8 = scmp.gt.s32.totalorder %s2443_s22, 0  ;;  %s2445_s15 = sadd.s32 4294967294, %s4046_s16 }
  0x68   : > { %p99_p9 = scmp.ne.s32.totalorder %s3748_s25, %s3744_s24  ;;  %s5424_s28 = smov (%p49_p6, %s5422_s28), 0 }
  0x69   : > { %5297 = sst [smem:[#allocation48_spill]] %s5424_s28  ;;  %s5426_s22 = smov (!%p81_p8, %s2443_s22), 0 }
  0x6a   : > { %s4055_s2 = ssub.s32 %s3776_s12, %s5424_s28  ;;  %p85_p10 = scmp.gt.s32.totalorder %s2445_s15, 0 }
  0x6b   : > { %p4059_p11 = por %p99_p9, %p5248_p3  ;;  %p105_p12 = scmp.ne.s32.totalorder %s3744_s24, %s3740_s23 }
  0x6c   : > { %s5428_s15 = smov (!%p85_p10, %s2445_s15), 0  ;;  %p5299_p13 = scmp.eq.s32.totalorder %s3962_s14, 0 }
  0x6d   : > { %p5247_p2 = scmp.lt.s32.totalorder %s3780_s13, 8  ;;  %s88_s26 = ssub.s32 %s5426_s22, %s5428_s15 }
  0x6e   : > { %p4067_p0 = por %p105_p12, %p5299_p13  ;;  %s4073_s17 = sshll.u32 %s3776_s12, 5 }
  0x6f   : > { %s89_s21 = sor.u32 %s88_s26, %s4055_s2  ;;  %s5252_s5 = sand.u32 1, %s3780_s13  }
  0x70   : > { %s5300_s0 = scalar_select %p4067_p0, 1, 0 }
  0x71   : > { %p90_p4 = scmp.eq.s32.totalorder %s89_s21, 0  ;;  %s449_s8 = sand.u32 1, %s3748_s25  }
  0x72   : > { %5301 = sst [smem:[#allocation49_spill]] %s5300_s0  ;;  %s2468_s28 = sshll.u32 %s5426_s22, 1 }
  0x73   : > { %s4079_s23 = scalar_select %p90_p4, %s3748_s25, %s92_s20  }
  0x74   : > { %s2465_s24 = sshll.u32 %s449_s8, 4  ;;  %s461_s11 = sadd.s32 %s2468_s28, %s4073_s17 }
  0x75   : > { %5302 = sst [smem:[#allocation50_spill]] %s4079_s23  ;;  %s2470_s27 = sshll.u32 %s461_s11, 7 }
  0x76   : > { %s5303_s1 = sld [smem:[#allocation54_spill]]  ;;  %s451_s15 = scalar_lea.vmem [#allocation8], %s2465_s24 }
  0x77   : > { %s464_s26 = sshll.u32 %s451_s15, 4  ;;  %p4093_p1 = pnand %p5247_p2, %p4059_p11  ;;  %s4087_s26 = int_to_ptr.vmem [resolvable:$true] %s464_s26 }
  0x78   : > { %s4099_s8 = scalar_lea.sflag [#allocation9], %s5252_s5 }
  0x79   : > { %p3358_p8 = pneg %p4093_p1 }
  0x7c   : > { %s4085_s4 = scalar_lea.hbm %s5303_s1, %s2470_s27  ;;  %s3361_s27 = scalar_lea.hbm %s5303_s1, 8192 }
  0x7d   : > { %s3356_s9 = scalar_lea.hbm %s4085_s4, 256  ;;  %p3362_p11 = scmp.lt.u32.totalorder %s4085_s4, %s5303_s1 }
  0x7e   : > { %p3357_p6 = scmp.ne.s32.totalorder %s4085_s4, %s3356_s9  ;;  %p3363_p12 = scmp.lt.u32.totalorder %s3361_s27, %s3356_s9 }
  0x7f   : > { %p3365_p4 = scmp.lt.u32.totalorder %s3356_s9, %s4085_s4 }
  0x80   : > { %p3359_p9 = pnand %p3358_p8, %p3357_p6  ;;  %p3364_p13 = por %p3363_p12, %p3362_p11 }
  0x82   : > { %p3360_p10 = pneg %p3359_p9  ;;  %p3366_p2 = por %p3365_p4, %p3364_p13 }
  0x84   : > { %p3367_p3 = pnand %p3366_p2, %p3360_p10 }
  0x86   : > { %3370 = shalt.err (!%p3367_p3)
}
  0x87   : > { %s3371_s22 = scalar_lea.vmem %s4087_s26, 256  ;;  %s3786_s29 = smov [#allocation8]  }
  0x88   : > { %p3372_p6 = scmp.ne.s32.totalorder %s4087_s26, %s3371_s22  ;;  %s3376_s0 = sshll.u32 %s3786_s29, 4  ;;  %s3377_s0 = int_to_ptr.vmem [resolvable:$false] %s3376_s0 }
  0x89   : > { %s3378_s15 = scalar_lea.vmem %s3377_s0, 512  ;;  %p3379_p5 = scmp.lt.s32.totalorder %s4087_s26, %s3377_s0 }
  0x8a   : > { %p3374_p9 = pnand %p3372_p6, %p3358_p8  ;;  %p3380_p11 = scmp.lt.s32.totalorder %s3378_s15, %s3371_s22 }
  0x8c   : > { %p3375_p0 = pneg %p3374_p9  ;;  %p3381_p12 = por %p3380_p11, %p3379_p5 }
  0x8e   : > { %p3382_p13 = pnand %p3381_p12, %p3375_p0 }
  0x90   : > { %3385 = shalt.err (!%p3382_p13)
}
  0x91   : > { %s5305_s9 = smov 8   ;;  %s5306_s24 = smov 128  }
  0x92   : > { %3077 = dma.hbm_to_vmem [thread:$0]  (!%p4093_p1), %s4085_s4, 256, %s4087_s26, %s4099_s8, %s5306_s24, %s5306_s24, %s5305_s9  }
  0x93   : > { %s4131_s11 = sadd.s32 4, %s4038_s10  ;;  %s4135_s21 = sadd.s32 4, %s4046_s16 }
  0x94   : > { %p153_p5 = scmp.lt.s32.totalorder %s4131_s11, 15  ;;  %p157_p3 = scmp.lt.s32.totalorder %s4135_s21, 15 }
  0x95   : > { %s164_s27 = sadd.s32 1, %s3724_s7  ;;  %p171_p0 = scmp.ne.s32.totalorder %s3724_s7, %s3720_s19 }
  0x96   : > { %s154_s28 = scalar_select %p153_p5, %s4131_s11, 15 }
  0x97   : > { %s158_s20 = scalar_select %p157_p3, %s4135_s21, 15 }
  0x98   : > { %p177_p2 = scmp.ne.s32.totalorder %s3720_s19, %s3716_s18  ;;  %p5307_p1 = scmp.eq.s32.totalorder %s3780_s13, 0 }
  0x99   : > { %s160_s22 = ssub.s32 %s154_s28, %s158_s20  ;;  %p5309_p4 = scmp.eq.s32.totalorder %s3962_s14, 0 }
  0x9a   : > { %s161_s4 = sor.u32 %s160_s22, %s4055_s2  ;;  %p4148_p8 = por %p171_p0, %p5307_p1 }
  0x9b   : > { %p162_p10 = scmp.eq.s32.totalorder %s161_s4, 0  ;;  %p4154_p6 = por %p177_p2, %p5309_p4 }
  0x9c   : > { %s503_s0 = sand.u32 1, %s3724_s7   ;;  %s2479_s15 = sshll.u32 %s154_s28, 1 }
  0x9d   : > { %s5310_s29 = scalar_select %p4154_p6, 1, 0 }
  0x9e   : > { %s4160_s5 = scalar_select %p162_p10, %s3724_s7, %s164_s27  }
  0x9f   : > { %s2477_s18 = sshll.u32 %s503_s0, 4  ;;  %s515_s20 = sadd.s32 %s2479_s15, %s4073_s17 }
  0xa0   : > { %5311 = sst [smem:[#allocation51_spill]] %s4160_s5  ;;  %s2481_s22 = sshll.u32 %s515_s20, 7 }
  0xa1   : > { %s5312_s3 = sld [smem:[#allocation56_spill]]  ;;  %s505_s4 = scalar_lea.vmem [#allocation11], %s2477_s18 }
  0xa2   : > { %s518_s25 = sshll.u32 %s505_s4, 4  ;;  %p5313_p9 = scmp.lt.s32.totalorder %s3780_s13, 8  ;;  %s4168_s25 = int_to_ptr.vmem [resolvable:$true] %s518_s25 }
  0xa3   : > { %s3787_s28 = smov [#allocation16]   ;;  %s5315_s12 = sand.u32 1, %s3780_s13  }
  0xa4   : > { %p4174_p11 = pnand %p5313_p9, %p4148_p8  ;;  %s4178_s1 = sshll.u32 %s3787_s28, 4  ;;  %s386_s1 = int_to_ptr.vmem [resolvable:$true] %s4178_s1 }
  0xa5   : > { %s4182_s0 = scalar_lea.sflag [#allocation12], %s5315_s12 }
  0xa6   : > { %p3388_p13 = pneg %p4174_p11 }
  0xa7   : > { %s4166_s23 = scalar_lea.hbm %s5312_s3, %s2481_s22  ;;  %s3391_s20 = scalar_lea.hbm %s5312_s3, 8192 }
  0xa8   : > { %s3386_s15 = scalar_lea.hbm %s4166_s23, 256  ;;  %p3392_p0 = scmp.lt.u32.totalorder %s4166_s23, %s5312_s3 }
  0xa9   : > { %p3387_p12 = scmp.ne.s32.totalorder %s4166_s23, %s3386_s15  ;;  %p3393_p2 = scmp.lt.u32.totalorder %s3391_s20, %s3386_s15 }
  0xaa   : > { %p3395_p8 = scmp.lt.u32.totalorder %s3386_s15, %s4166_s23 }
  0xab   : > { %p3389_p5 = pnand %p3388_p13, %p3387_p12  ;;  %p3394_p1 = por %p3393_p2, %p3392_p0 }
  0xad   : > { %p3390_p3 = pneg %p3389_p5  ;;  %p3396_p10 = por %p3395_p8, %p3394_p1 }
  0xaf   : > { %p3397_p4 = pnand %p3396_p10, %p3390_p3 }
  0xb1   : > { %3400 = shalt.err (!%p3397_p4)
}
  0xb2   : > { %s3401_s28 = scalar_lea.vmem %s4168_s25, 256  ;;  %s3788_s12 = smov [#allocation11]  }
  0xb3   : > { %p3402_p9 = scmp.ne.s32.totalorder %s4168_s25, %s3401_s28  ;;  %s3406_s26 = sshll.u32 %s3788_s12, 4  ;;  %s3407_s26 = int_to_ptr.vmem [resolvable:$false] %s3406_s26 }
  0xb4   : > { %s3408_s18 = scalar_lea.vmem %s3407_s26, 512  ;;  %p3409_p6 = scmp.lt.s32.totalorder %s4168_s25, %s3407_s26 }
  0xb5   : > { %p3404_p12 = pnand %p3402_p9, %p3388_p13  ;;  %p3410_p0 = scmp.lt.s32.totalorder %s3408_s18, %s3401_s28 }
  0xb7   : > { %p3405_p5 = pneg %p3404_p12  ;;  %p3411_p2 = por %p3410_p0, %p3409_p6 }
  0xb9   : > { %p3412_p1 = pnand %p3411_p2, %p3405_p5 }
  0xbb   : > { %3415 = shalt.err (!%p3412_p1)
}
  0xbc   : > { %3083 = dma.hbm_to_vmem [thread:$0]  (!%p4174_p11), %s4166_s23, 256, %s4168_s25, %s4182_s0, %s5306_s24, %s5306_s24, %s5305_s9  }
  0xbd   : > { %s3789_s15 = smov [#allocation19]   ;;  %s5316_s6 = sld [smem:[#allocation59_spill]] }
  0xbe   : > { %s412_s20 = sshll.u32 %s3789_s15, 4  ;;  %s413_s20 = int_to_ptr.vmem [resolvable:$true] %s412_s20 }
  0xc3   : > { %s3416_s28 = scalar_lea.hbm %s5316_s6, 16 }
  0xc4   : > { %p3417_p6 = scmp.ne.s32.totalorder %s5316_s6, %s3416_s28  ;;  %p3423_p8 = scmp.lt.u32.totalorder %s3416_s28, %s5316_s6 }
  0xc6   : > { %p3419_p13 = pnand %p3417_p6, %p3989_p7 }
  0xc8   : > { %p3420_p3 = pneg %p3419_p13 }
  0xca   : > { %p3425_p10 = pnand %p3423_p8, %p3420_p3 }
  0xcc   : > { %3428 = shalt.err (!%p3425_p10)
}
  0xcd   : > { %s3429_s25 = scalar_lea.vmem %s386_s1, 16  ;;  %s3436_s23 = scalar_lea.vmem %s386_s1, 32 }
  0xce   : > { %p3430_p11 = scmp.ne.s32.totalorder %s386_s1, %s3429_s25  ;;  %p3437_p12 = scmp.lt.s32.totalorder %s386_s1, %s386_s1 }
  0xcf   : > { %p3438_p5 = scmp.lt.s32.totalorder %s3436_s23, %s3429_s25 }
  0xd0   : > { %p3432_p4 = pnand %p3430_p11, %p3989_p7 }
  0xd1   : > { %p3439_p0 = por %p3438_p5, %p3437_p12 }
  0xd2   : > { %p3433_p9 = pneg %p3432_p4 }
  0xd4   : > { %p3440_p2 = pnand %p3439_p0, %p3433_p9 }
  0xd6   : > { %3443 = shalt.err (!%p3440_p2)
}
  0xd7   : > { %s5317_s15 = sld [smem:[#allocation46_spill]] }
  0xd8   : > { %s5319_s26 = sld [smem:[#allocation61_spill]] }
  0xdd   : > { %p5318_p1 = scmp.ne.s32.totalorder %s5317_s15, 0 }
  0xde   : > { %s5320_s3 = smov %s5319_s26  ;;  %s3444_s27 = scalar_lea.hbm %s5319_s26, 16 }
  0xdf   : > { %3064 = dma.hbm_to_vmem [thread:$0]  (!%p5318_p1), %s5316_s6, 16, %s386_s1, [#allocation15]  }
  0xe0   : > { %p3445_p6 = scmp.ne.s32.totalorder %s5320_s3, %s3444_s27  ;;  %p3451_p8 = scmp.lt.u32.totalorder %s3444_s27, %s5320_s3 }
  0xe2   : > { %p3447_p13 = pnand %p3445_p6, %p3989_p7 }
  0xe4   : > { %p3448_p3 = pneg %p3447_p13 }
  0xe6   : > { %p3453_p10 = pnand %p3451_p8, %p3448_p3 }
  0xe8   : > { %3456 = shalt.err (!%p3453_p10)
}
  0xe9   : > { %s3457_s22 = scalar_lea.vmem %s413_s20, 16  ;;  %s3464_s1 = scalar_lea.vmem %s413_s20, 32 }
  0xea   : > { %p3458_p11 = scmp.ne.s32.totalorder %s413_s20, %s3457_s22  ;;  %p3465_p12 = scmp.lt.s32.totalorder %s413_s20, %s413_s20 }
  0xeb   : > { %p3466_p5 = scmp.lt.s32.totalorder %s3464_s1, %s3457_s22 }
  0xec   : > { %p3460_p4 = pnand %p3458_p11, %p3989_p7 }
  0xed   : > { %p3467_p0 = por %p3466_p5, %p3465_p12 }
  0xee   : > { %p3461_p9 = pneg %p3460_p4 }
  0xf0   : > { %p3468_p2 = pnand %p3467_p0, %p3461_p9 }
  0xf2   : > { %3471 = shalt.err (!%p3468_p2)
}
  0xf3   : > { %s5321_s28 = sld [smem:[#allocation47_spill]]  ;;  %s5322_s12 = sld [smem:[#allocation43_spill]] }
  0xf4   : > { %s5323_s26 = sld [smem:[#allocation40_spill]]  ;;  %s5324_s27 = sld [smem:[#allocation39_spill]] }
  0xf5   : > { %s5325_s30 = sld [smem:[#allocation38_spill]]  ;;  %s2441_s18 = sadd.s32 4294967294, %s3780_s13  }
  0xf6   : > { %3070 = dma.hbm_to_vmem [thread:$0]  (!%p5318_p1), %s5320_s3, 16, %s413_s20, [#allocation18]  }
  0xf7   : > { %p5326_p3 = scmp.eq.s32.totalorder %s3780_s13, 0  ;;  %p346_p10 = scmp.eq.s32.totalorder %s3962_s14, 7 }
  0xf8   : > { %p5329_p1 = scmp.eq.s32.totalorder %s3962_s14, 0  ;;  %p352_p9 = scmp.eq.s32.totalorder %s2441_s18, 7 }
  0xf9   : > { %s52_s15 = ssub.s32 %s5322_s12, %s5321_s28  ;;  %p5334_p5 = scmp.lt.s32.totalorder %s3780_s13, 8 }
  0xfa   : > { %s56_s25 = sadd.s32 1, %s5323_s26  ;;  %s53_s23 = sor.u32 %s52_s15, %s4055_s2 }
  0xfb   : > { %p63_p7 = scmp.ne.s32.totalorder %s5323_s26, %s5324_s27  ;;  %p54_p6 = scmp.eq.s32.totalorder %s53_s23, 0 }
  0xfc   : > { %p69_p13 = scmp.ne.s32.totalorder %s5324_s27, %s5325_s30  ;;  %s423_s4 = sand.u32 1, %s5323_s26  }
  0xfd   : > { %p4261_p8 = por %p5326_p3, %p63_p7  ;;  %p4275_p4 = por %p346_p10, %p63_p7 }
  0xfe   : > { %s4267_s1 = scalar_select %p54_p6, %s5323_s26, %s56_s25  }
  0xff   : > { %p4271_p11 = por %p5329_p1, %p69_p13  ;;  %s2460_s28 = sshll.u32 %s423_s4, 6 }
 0x100   : > { %5328 = sst [smem:[#allocation52_spill]] %s4267_s1  ;;  %p4280_p12 = por %p352_p9, %p69_p13 }
 0x101   : > { %s5331_s5 = scalar_select %p4275_p4, 1, 0 }
 0x102   : > { %s5332_s27 = scalar_select %p4280_p12, 1, 0 }
 0x103   : > { %s2584_s30 = sshll.u32 %s5322_s12, 3  ;;  %s427_s15 = scalar_lea.vmem [#allocation5], %s2460_s28 }
 0x104   : > { %5333 = sst [smem:[#allocation46_spill]] %s5332_s27  ;;  %s437_s25 = sshll.u32 %s427_s15, 4  ;;  %s4286_s25 = int_to_ptr.vmem [resolvable:$true] %s437_s25 }
 0x105   : > { %s434_s23 = sadd.s32 %s2584_s30, %s4073_s17  ;;  %p4292_p0 = pnand %p5334_p5, %p4261_p8 }
 0x106   : > { %s2464_s3 = sshll.u32 %s434_s23, 7  ;;  %s5336_s1 = sld [smem:[#allocation53_spill]] }
 0x107   : > { %s4301_s12 = scalar_lea.sflag [#allocation6], %s423_s4  ;;  %p3474_p7 = pneg %p4292_p0 }
 0x10c   : > { %s4299_s7 = scalar_lea.hbm %s5336_s1, %s2464_s3  ;;  %s3477_s15 = scalar_lea.hbm %s5336_s1, 8192 }
 0x10d   : > { %s3472_s28 = scalar_lea.hbm %s4299_s7, 1024  ;;  %p3478_p3 = scmp.lt.u32.totalorder %s4299_s7, %s5336_s1 }
 0x10e   : > { %p3473_p2 = scmp.ne.s32.totalorder %s4299_s7, %s3472_s28  ;;  %p3479_p8 = scmp.lt.u32.totalorder %s3477_s15, %s3472_s28 }
 0x10f   : > { %p3481_p1 = scmp.lt.u32.totalorder %s3472_s28, %s4299_s7 }
 0x110   : > { %p3475_p6 = pnand %p3474_p7, %p3473_p2  ;;  %p3480_p10 = por %p3479_p8, %p3478_p3 }
 0x112   : > { %p3476_p13 = pneg %p3475_p6  ;;  %p3482_p9 = por %p3481_p1, %p3480_p10 }
 0x114   : > { %p3483_p5 = pnand %p3482_p9, %p3476_p13 }
 0x116   : > { %3486 = shalt.err (!%p3483_p5)
}
 0x117   : > { %s3487_s4 = scalar_lea.vmem %s4286_s25, 1024  ;;  %s3790_s18 = smov [#allocation5]  }
 0x118   : > { %p3488_p2 = scmp.ne.s32.totalorder %s4286_s25, %s3487_s4  ;;  %s3492_s26 = sshll.u32 %s3790_s18, 4  ;;  %s3493_s26 = int_to_ptr.vmem [resolvable:$false] %s3492_s26 }
 0x119   : > { %s3494_s22 = scalar_lea.vmem %s3493_s26, 2048  ;;  %p3495_p4 = scmp.lt.s32.totalorder %s4286_s25, %s3493_s26 }
 0x11a   : > { %p3490_p6 = pnand %p3488_p2, %p3474_p7  ;;  %p3496_p3 = scmp.lt.s32.totalorder %s3494_s22, %s3487_s4 }
 0x11c   : > { %p3491_p12 = pneg %p3490_p6  ;;  %p3497_p8 = por %p3496_p3, %p3495_p4 }
 0x11e   : > { %p3498_p10 = pnand %p3497_p8, %p3491_p12 }
 0x120   : > { %3501 = shalt.err (!%p3498_p10)
}
 0x121   : > { %s5337_s28 = sld [smem:[#allocation35_spill]]  ;;  %s5338_s30 = sld [smem:[#allocation34_spill]] }
 0x122   : > { %s5339_s15 = sld [smem:[#allocation33_spill]]  ;;  %s2447_s3 = sadd.s32 4294967295, %s4038_s10 }
 0x123   : > { %3074 = dma.hbm_to_vmem [thread:$0]  (!%p4292_p0), %s4299_s7, 1024, %s4286_s25, %s4301_s12, %s5306_s24, %s5306_s24, %s5305_s9  }
 0x124   : > { %s2449_s6 = sadd.s32 4294967295, %s4046_s16  ;;  %p117_p4 = scmp.gt.s32.totalorder %s2447_s3, 0 }
 0x125   : > { %p121_p12 = scmp.gt.s32.totalorder %s2449_s6, 0  ;;  %p5340_p13 = scmp.eq.s32.totalorder %s3780_s13, 0 }
 0x126   : > { %s5430_s3 = smov (!%p117_p4, %s2447_s3), 0  ;;  %p5342_p0 = scmp.eq.s32.totalorder %s3962_s14, 0 }
 0x127   : > { %s128_s23 = sadd.s32 1, %s5337_s28  ;;  %p135_p7 = scmp.ne.s32.totalorder %s5337_s28, %s5338_s30 }
 0x128   : > { %s5432_s6 = smov (!%p121_p12, %s2449_s6), 0  ;;  %p141_p9 = scmp.ne.s32.totalorder %s5338_s30, %s5339_s15 }
 0x129   : > { %p4339_p1 = por %p135_p7, %p5340_p13  ;;  %s124_s18 = ssub.s32 %s5430_s3, %s5432_s6 }
 0x12a   : > { %s476_s7 = sand.u32 1, %s5337_s28   ;;  %s125_s10 = sor.u32 %s124_s18, %s4055_s2 }
 0x12b   : > { %p4349_p5 = por %p141_p9, %p5342_p0  ;;  %p126_p2 = scmp.eq.s32.totalorder %s125_s10, 0 }
 0x12c   : > { %s2471_s25 = sshll.u32 %s476_s7, 4  ;;  %s2474_s12 = sshll.u32 %s5430_s3, 1 }
 0x12d   : > { %s5343_s16 = scalar_select %p4349_p5, 1, 0 }
 0x12e   : > { %s5434_s28 = smov (!%p126_p2, %s5337_s28), %s128_s23  ;;  %s488_s26 = sadd.s32 %s2474_s12, %s4073_s17 }
 0x12f   : > { %s478_s22 = scalar_lea.vmem [#allocation10], %s2471_s25  ;;  %s2476_s27 = sshll.u32 %s488_s26, 7 }
 0x130   : > { %s491_s1 = sshll.u32 %s478_s22, 4  ;;  %s5344_s6 = sld [smem:[#allocation55_spill]]  ;;  %s4357_s1 = int_to_ptr.vmem [resolvable:$true] %s491_s1 }
 0x131   : > { %p5345_p6 = scmp.lt.s32.totalorder %s3780_s13, 8 }
 0x133   : > { %p4368_p3 = pnand %p5345_p6, %p4339_p1 }
 0x135   : > { %p3504_p10 = pneg %p4368_p3 }
 0x136   : > { %s4362_s18 = scalar_lea.hbm %s5344_s6, %s2476_s27  ;;  %s3507_s7 = scalar_lea.hbm %s5344_s6, 8192 }
 0x137   : > { %s3502_s23 = scalar_lea.hbm %s4362_s18, 256  ;;  %p3508_p7 = scmp.lt.u32.totalorder %s4362_s18, %s5344_s6 }
 0x138   : > { %p3503_p8 = scmp.ne.s32.totalorder %s4362_s18, %s3502_s23  ;;  %p3509_p13 = scmp.lt.u32.totalorder %s3507_s7, %s3502_s23 }
 0x139   : > { %p3511_p9 = scmp.lt.u32.totalorder %s3502_s23, %s4362_s18 }
 0x13a   : > { %p3505_p4 = pnand %p3504_p10, %p3503_p8  ;;  %p3510_p1 = por %p3509_p13, %p3508_p7 }
 0x13c   : > { %p3506_p12 = pneg %p3505_p4  ;;  %p3512_p0 = por %p3511_p9, %p3510_p1 }
 0x13e   : > { %p3513_p2 = pnand %p3512_p0, %p3506_p12 }
 0x140   : > { %3516 = shalt.err (!%p3513_p2)
}
 0x141   : > { %s3517_s12 = scalar_lea.vmem %s4357_s1, 256  ;;  %s3791_s26 = smov [#allocation10]  }
 0x142   : > { %p3518_p6 = scmp.ne.s32.totalorder %s4357_s1, %s3517_s12  ;;  %s3522_s22 = sshll.u32 %s3791_s26, 4  ;;  %s3523_s22 = int_to_ptr.vmem [resolvable:$false] %s3522_s22 }
 0x143   : > { %s3524_s30 = scalar_lea.vmem %s3523_s22, 512  ;;  %p3525_p5 = scmp.lt.s32.totalorder %s4357_s1, %s3523_s22 }
 0x144   : > { %p3520_p8 = pnand %p3518_p6, %p3504_p10  ;;  %p3526_p7 = scmp.lt.s32.totalorder %s3524_s30, %s3517_s12 }
 0x146   : > { %p3521_p4 = pneg %p3520_p8  ;;  %p3527_p13 = por %p3526_p7, %p3525_p5 }
 0x148   : > { %p3528_p1 = pnand %p3527_p13, %p3521_p4 }
 0x14a   : > { %3531 = shalt.err (!%p3528_p1)
}
 0x14b   : > { %s5347_s15 = sld [smem:[#allocation31_spill]]  ;;  %s5348_s23 = sld [smem:[#allocation30_spill]] }
 0x14c   : > { %s5349_s27 = sld [smem:[#allocation29_spill]]  ;;  %s189_s4 = sadd.s32 1, %s4131_s11 }
 0x14d   : > { %3080 = dma.hbm_to_vmem [thread:$0]  (!%p4368_p3), %s4362_s18, 256, %s4357_s1, %s4099_s8, %s5306_s24, %s5306_s24, %s5305_s9  }
 0x14e   : > { %p190_p5 = scmp.lt.s32.totalorder %s189_s4, 15  ;;  %s194_s3 = sadd.s32 1, %s4135_s21 }
 0x14f   : > { %p195_p10 = scmp.lt.s32.totalorder %s194_s3, 15  ;;  %p5350_p0 = scmp.eq.s32.totalorder %s3780_s13, 0 }
 0x150   : > { %s5436_s4 = smov (!%p190_p5, %s189_s4), 15  ;;  %p5351_p8 = scmp.eq.s32.totalorder %s3962_s14, 0 }
 0x151   : > { %s202_s7 = sadd.s32 1, %s5347_s15  ;;  %s5438_s3 = smov (!%p195_p10, %s194_s3), 15 }
 0x152   : > { %p209_p12 = scmp.ne.s32.totalorder %s5347_s15, %s5348_s23  ;;  %p215_p9 = scmp.ne.s32.totalorder %s5348_s23, %s5349_s27 }
 0x153   : > { %s198_s10 = ssub.s32 %s5436_s4, %s5438_s3  ;;  %s530_s25 = sand.u32 1, %s5347_s15  }
 0x154   : > { %s199_s12 = sor.u32 %s198_s10, %s4055_s2  ;;  %p211_p2 = por %p209_p12, %p5350_p0 }
 0x155   : > { %p200_p6 = scmp.eq.s32.totalorder %s199_s12, 0  ;;  %p4414_p3 = por %p215_p9, %p5351_p8 }
 0x156   : > { %s2482_s11 = sshll.u32 %s530_s25, 4  ;;  %s2484_s21 = sshll.u32 %s5436_s4, 1 }
 0x157   : > { %s5352_s8 = scalar_select %p4414_p3, 1, 0 }
 0x158   : > { %s5440_s15 = smov (!%p200_p6, %s5347_s15), %s202_s7  ;;  %s543_s1 = sadd.s32 %s2484_s21, %s4073_s17 }
 0x159   : > { %s2486_s18 = sshll.u32 %s543_s1, 7  ;;  %s532_s26 = scalar_lea.vmem [#allocation13], %s2482_s11 }
 0x15a   : > { %s546_s22 = sshll.u32 %s532_s26, 4  ;;  %s5353_s27 = sld [smem:[#allocation57_spill]]  ;;  %s4427_s22 = int_to_ptr.vmem [resolvable:$true] %s546_s22 }
 0x15b   : > { %p5355_p4 = scmp.lt.s32.totalorder %s3780_s13, 8 }
 0x15d   : > { %p4431_p7 = pnand %p5355_p4, %p211_p2 }
 0x15f   : > { %p3534_p1 = pneg %p4431_p7 }
 0x160   : > { %s5354_s3 = smov %s5353_s27  ;;  %s4425_s2 = scalar_lea.hbm %s5353_s27, %s2486_s18 }
 0x161   : > { %s3532_s17 = scalar_lea.hbm %s4425_s2, 256  ;;  %s3537_s25 = scalar_lea.hbm %s5354_s3, 8192 }
 0x162   : > { %p3533_p13 = scmp.ne.s32.totalorder %s4425_s2, %s3532_s17  ;;  %p3538_p12 = scmp.lt.u32.totalorder %s4425_s2, %s5354_s3 }
 0x163   : > { %p3539_p9 = scmp.lt.u32.totalorder %s3537_s25, %s3532_s17  ;;  %p3541_p2 = scmp.lt.u32.totalorder %s3532_s17, %s4425_s2 }
 0x164   : > { %p3535_p5 = pnand %p3534_p1, %p3533_p13 }
 0x165   : > { %p3540_p0 = por %p3539_p9, %p3538_p12 }
 0x166   : > { %p3536_p10 = pneg %p3535_p5 }
 0x167   : > { %p3542_p6 = por %p3541_p2, %p3540_p0 }
 0x169   : > { %p3543_p8 = pnand %p3542_p6, %p3536_p10 }
 0x16b   : > { %3546 = shalt.err (!%p3543_p8)
}
 0x16c   : > { %s3547_s21 = scalar_lea.vmem %s4427_s22, 256  ;;  %s3792_s1 = smov [#allocation13]  }
 0x16d   : > { %p3548_p4 = scmp.ne.s32.totalorder %s4427_s22, %s3547_s21  ;;  %s3552_s18 = sshll.u32 %s3792_s1, 4  ;;  %s3553_s18 = int_to_ptr.vmem [resolvable:$false] %s3552_s18 }
 0x16e   : > { %s3554_s26 = scalar_lea.vmem %s3553_s18, 512  ;;  %p3555_p3 = scmp.lt.s32.totalorder %s4427_s22, %s3553_s18 }
 0x16f   : > { %p3550_p13 = pnand %p3548_p4, %p3534_p1  ;;  %p3556_p12 = scmp.lt.s32.totalorder %s3554_s26, %s3547_s21 }
 0x171   : > { %p3551_p5 = pneg %p3550_p13  ;;  %p3557_p9 = por %p3556_p12, %p3555_p3 }
 0x173   : > { %p3558_p0 = pnand %p3557_p9, %p3551_p5 }
 0x175   : > { %3561 = shalt.err (!%p3558_p0)
}
 0x176   : > { %3086 = dma.hbm_to_vmem [thread:$0]  (!%p4431_p7), %s4425_s2, 256, %s4427_s22, %s4182_s0, %s5306_s24, %s5306_s24, %s5305_s9  }
 0x177   : > { %s5357_s30 = sld [smem:[#allocation45_spill]] }
 0x17d   : > { %p5358_p1 = scmp.ne.s32.totalorder %s5357_s30, 0 }
 0x17e   : > { %s5359_s23 = sld [smem:[#allocation39_spill]] (!%p5358_p1) }
 0x17f   : > { %558 = sbr.rel (%p5358_p1) target bundleno = 1351 (0x547), region = 60 }
 0x184   : > { %s4467_s27 = sand.u32 (!%p5358_p1), 1, %s5359_s23  }
 0x185   : > { %s2488_s17 = sshll.u32 (!%p5358_p1), %s4467_s27, 6  ;;  %s561_s7 = scalar_lea.sflag (!%p5358_p1), [#allocation6], %s4467_s27 }
 0x186   : > { %s4473_s4 = scalar_lea.vmem [#allocation5], %s2488_s17 }
 0x187   : > { %3671 = dma.done.wait (%p4271_p11), %s561_s7, 1024  }
 0x188   : > { %3673 = vsyncadd (%p4271_p11), %s561_s7, 4294966272  ;;  %s5360_s9 = sld [smem:[#allocation36_spill]]  ;;  %s5361_s24 = sld [smem:[#allocation49_spill]] }
 0x189   : > { %s569_s0 = sand.u32 1, %s3962_s14  }
 0x18a   : > { %s570_s10 = scalar_lea.sflag [#allocation9], %s569_s0 }
 0x18e   : > { %s571_s22 = sand.u32 1, %s5360_s9   ;;  %p5362_p3 = scmp.ne.s32.totalorder %s5361_s24, 0 }
 0x18f   : > { %s4481_s2 = sshll.u32 %s571_s22, 4 }
 0x190   : > { %s573_s25 = scalar_lea.vmem [#allocation8], %s4481_s2 }
 0x191   : > { %3675 = dma.done.wait (%p5362_p3), %s570_s10, 256  }
 0x192   : > { %3677 = vsyncadd (%p5362_p3), %s570_s10, 4294967040  ;;  %s5363_s12 = sld [smem:[#allocation34_spill]]  ;;  %p5364_p11 = scmp.ne.s32.totalorder %s5343_s16, 0 }
 0x198   : > { %s580_s11 = sand.u32 1, %s5363_s12  }
 0x199   : > { %s4489_s20 = sshll.u32 %s580_s11, 4 }
 0x19a   : > { %s582_s21 = scalar_lea.vmem [#allocation10], %s4489_s20 }
 0x19b   : > { %3679 = dma.done.wait (%p5364_p11), %s570_s10, 256  }
 0x19c   : > { %3681 = vsyncadd (%p5364_p11), %s570_s10, 4294967040  ;;  %s589_s1 = sand.u32 1, %s3720_s19   ;;  %s588_s26 = scalar_lea.sflag [#allocation12], %s569_s0 }
 0x19d   : > { %s4497_s18 = sshll.u32 %s589_s1, 4  ;;  %p5365_p7 = scmp.ne.s32.totalorder %s5310_s29, 0 }
 0x19e   : > { %s591_s30 = scalar_lea.vmem [#allocation11], %s4497_s18 }
 0x19f   : > { %3683 = dma.done.wait (%p5365_p7), %s588_s26, 256  }
 0x1a0   : > { %3685 = vsyncadd (%p5365_p7), %s588_s26, 4294967040  ;;  %s5366_s23 = sld [smem:[#allocation30_spill]]  ;;  %p5367_p10 = scmp.ne.s32.totalorder %s5352_s8, 0 }
 0x1a6   : > { %s598_s7 = sand.u32 1, %s5366_s23  }
 0x1a7   : > { %s4505_s9 = sshll.u32 %s598_s7, 4 }
 0x1a8   : > { %s600_s16 = scalar_lea.vmem [#allocation13], %s4505_s9 }
 0x1a9   : > { %3687 = dma.done.wait (%p5367_p10), %s588_s26, 256  }
 0x1aa   : > { %3689 = vsyncadd (%p5367_p10), %s588_s26, 4294967040  ;;  %p5368_p2 = scmp.eq.s32.totalorder %s3962_s14, 0 }
 0x1ac   : > { %3691 = dma.done.wait (%p5368_p2), [#allocation15], 784   ;;  %p5369_p6 = pmov %p5368_p2 }
 0x1ad   : > { %p5370_p8 = pmov %p5368_p2 }
 0x1ae   : > { %3693 = vsyncadd (%p5369_p6), [#allocation15], 4294966512 }
 0x1af   : > { %3695 = dma.done.wait (%p5370_p8), [#allocation18], 4624   ;;  %p5371_p4 = pmov %p5368_p2 }
 0x1b0   : > { %s5372_s29 = sld [smem:[#allocation41_spill]]  ;;  %vm692_vm0 = vcmask 24576   ;;  %v3793_v0 = vmov 0.0   ;;  %vm701_vm1 = vcmask 90176   ;;  %v952_v1 = vld [vmem:[#allocation14] sm:$0xff]  ;;  %vm991_vm2 = vcmask 1043456  }
 0x1b1   : > { %3697 = vsyncadd (%p5371_p4), [#allocation18], 4294962672  ;;  %693 = vst.msk [vmem:[#allocation2] sm:$0x1] %vm692_vm0, %v3793_v0  ;;  %v953_v2 = vld [vmem:[#allocation14 + $0x8] sm:$0xf] }
 0x1b2   : > { %694 = vst.msk [vmem:[#allocation2 + $0x10] sm:$0x1] %vm692_vm0, %v3793_v0  ;;  %695 = vst.msk [vmem:[#allocation2 + $0x20] sm:$0x1] %vm692_vm0, %v3793_v0  ;;  %v2868_v3 = vpack.c.bf16 %v953_v2, %v952_v1  ;;  %vm3794_vm3 = vmmov 1   ;;  %s3795_s26 = smov 8  }
 0x1b3   : > { %696 = vst.msk [vmem:[#allocation2 + $0x30] sm:$0x1] %vm692_vm0, %v3793_v0  ;;  %697 = vst.msk [vmem:[#allocation2 + $0x40] sm:$0x1] %vm692_vm0, %v3793_v0  ;;  %s3796_s23 = smov 4   ;;  %v4632_v9 = vld [vmem:[%s4473_s4 + $0x8] sm:$0xff] }
 0x1b4   : > { %698 = vst.msk [vmem:[#allocation2 + $0x50] sm:$0x1] %vm692_vm0, %v3793_v0  ;;  %699 = vst.msk [vmem:[#allocation2 + $0x60] sm:$0x1] %vm692_vm0, %v3793_v0  ;;  %v4635_v10 = vld [vmem:[%s4473_s4] sm:$0xff]  ;;  %v1145_v11 = vld [vmem:[#allocation14 + $0x10] sm:$0xff] }
 0x1b5   : > { %700 = vst.msk [vmem:[#allocation2 + $0x70] sm:$0x1] %vm692_vm0, %v3793_v0  ;;  %vm4565_vm4 = vmpackc.low %vm991_vm2, %vm3794_vm3  ;;  %v1146_v12 = vld [vmem:[#allocation14 + $0x18] sm:$0xf]  ;;  %v4649_v14 = vld [vmem:[%s4473_s4 + $0x10] sm:$0xff]  ;;  %vm730_vm5 = vcmask 64544  }
 0x1b6   : > { %s2498_s24 = sshll.u32 %s5372_s29, 2  ;;  %702 = vst.msk [vmem:[#allocation2 + $0xf] sm:$0x1] %vm701_vm1, %v3793_v0  ;;  %703 = vst.msk [vmem:[#allocation2 + $0x1f] sm:$0x1] %vm701_vm1, %v3793_v0  ;;  %2870 = vmatprep.subr.msk.bf16.mxu0 %vm4565_vm4, %v2868_v3  ;;  %v4646_v13 = vld [vmem:[%s4473_s4 + $0x18] sm:$0xff]  ;;  %v4651_v15 = vpack.c.bf16 %v1146_v12, %v1145_v11 }
 0x1b7   : > { %s2499_s0 = sadd.s32 4294967294, %s2498_s24  ;;  %s2500_s22 = sadd.s32 4294967295, %s2498_s24  ;;  %704 = vst.msk [vmem:[#allocation2 + $0x2f] sm:$0x1] %vm701_vm1, %v3793_v0  ;;  %705 = vst.msk [vmem:[#allocation2 + $0x3f] sm:$0x1] %vm701_vm1, %v3793_v0  ;;  %2873 = vmatpush3.bf16.msk.msra.mxu0 %vm4565_vm4, %v2868_v3 }
 0x1b8   : > { %p4529_p13 = scmp.lt.s32.totalorder %s2499_s0, 0  ;;  %p4533_p5 = scmp.ge.s32.totalorder %s2499_s0, 16  ;;  %706 = vst.msk [vmem:[#allocation2 + $0x4f] sm:$0x1] %vm701_vm1, %v3793_v0  ;;  %707 = vst.msk [vmem:[#allocation2 + $0x5f] sm:$0x1] %vm701_vm1, %v3793_v0  ;;  %2876 = vmatprep.subr.msk.bf16.mxu0 %vm4565_vm4, %v4651_v15 }
 0x1b9   : > { %s4537_s10 = sadd.s32 4, %s2498_s24  ;;  %708 = vst.msk [vmem:[#allocation2 + $0x6f] sm:$0x1] %vm701_vm1, %v3793_v0  ;;  %709 = vst.msk [vmem:[#allocation2 + $0x7f] sm:$0x1] %vm701_vm1, %v3793_v0  ;;  %p4551_p9 = scmp.lt.s32.totalorder %s2500_s22, 0 }
 0x1ba   : > { %p716_p12 = por %p4533_p5, %p4529_p13  ;;  %p4555_p0 = scmp.ge.s32.totalorder %s2500_s22, 16  ;;  %v4665_v16 = vld [vmem:[%s4473_s4 + $0x28] sm:$0xff]  ;;  %v4668_v17 = vld [vmem:[%s4473_s4 + $0x20] sm:$0xff]  ;;  %v4679_v18 = vld [vmem:[%s4473_s4 + $0x38] sm:$0xff]  ;;  %vm733_vm6 = vcmask 31744   ;;  %vm735_vm7 = vcmask 30720  }
 0x1bb   : > { %p872_p1 = scmp.lt.s32.totalorder %s4537_s10, 0  ;;  %p873_p11 = scmp.ge.s32.totalorder %s4537_s10, 16  ;;  %v4682_v19 = vld [vmem:[%s4473_s4 + $0x30] sm:$0xff]  ;;  %vm743_vm8 = vcmask 97345   ;;  %vm745_vm9 = vcmask 97344   ;;  %v1336_v30 = vld [vmem:[#allocation14 + $0x20] sm:$0xff] }
 0x1bc   : > { %p752_p3 = por %p4555_p0, %p4551_p9  ;;  %s901_s24 = sadd.s32 1, %s4537_s10  ;;  %v1337_v31 = vld [vmem:[#allocation14 + $0x28] sm:$0xf]  ;;  %vm954_vm10 = vcmask 97280   ;;  %vm1559_vm11 = vcmask 778752   ;;  %vm1552_vm12 = vcmask 253952  }
 0x1bd   : > { %s3277_s1 = scalar_select %p716_p12, 0, 255  ;;  %v4747_v36 = vpack.c.bf16 %v1337_v31, %v1336_v30  ;;  %1560 = vst.msk [vmem:[#allocation3 + $0xf] sm:$0x1] %vm1559_vm11, %v3793_v0  ;;  %1561 = vst.msk [vmem:[#allocation3 + $0x1f] sm:$0x1] %vm1559_vm11, %v3793_v0 }
 0x1be   : > { %p4581_p7 = por %p873_p11, %p872_p1  ;;  %p4607_p10 = scmp.lt.s32.totalorder %s901_s24, 0  ;;  %1562 = vst.msk [vmem:[#allocation3 + $0x2f] sm:$0x1] %vm1559_vm11, %v3793_v0  ;;  %1563 = vst.msk [vmem:[#allocation3 + $0x3f] sm:$0x1] %vm1559_vm11, %v3793_v0 }
 0x1bf   : > { %v4571_v5 = vld [vmem:[%s573_s25] sm:%s3277_s1]  ;;  %v4588_v6 = vld [vmem:[%s573_s25 + $0x8] sm:%s3277_s1]  ;;  %s3283_s0 = scalar_select %p752_p3, 0, 255  ;;  %1564 = vst.msk [vmem:[#allocation3 + $0x4f] sm:$0x1] %vm1559_vm11, %v3793_v0 }
 0x1c0   : > { %737 = vrot.lane.b32.xlu1 %v4571_v5, %s3795_s26  ;;  %724 = vrot.lane.b32.xlu0 %v4571_v5, %s3796_s23  ;;  %p4611_p2 = scmp.ge.s32.totalorder %s901_s24, 16  ;;  %1565 = vst.msk [vmem:[#allocation3 + $0x5f] sm:$0x1] %vm1559_vm11, %v3793_v0  ;;  %v4868_v12 = vld [vmem:[#allocation16] ss:$0 sm:$0xff]  ;;  %s3797_s18 = smov 32  }
 0x1c1   : > { %v4605_v7 = vld [vmem:[%s582_s21 + $0x8] sm:%s3283_s0]  ;;  %v4617_v8 = vld [vmem:[%s582_s21] sm:%s3283_s0]  ;;  %s3289_s20 = scalar_select %p4581_p7, 0, 255  ;;  %1553 = vst.msk [vmem:[#allocation3] sm:$0x1] %vm1552_vm12, %v3793_v0 }
 0x1c2   : > { %p906_p6 = por %p4611_p2, %p4607_p10  ;;  %s1514_s21 = sld [smem:[#allocation4]]  ;;  %1554 = vst.msk [vmem:[#allocation3 + $0x10] sm:$0x1] %vm1552_vm12, %v3793_v0  ;;  %1555 = vst.msk [vmem:[#allocation3 + $0x20] sm:$0x1] %vm1552_vm12, %v3793_v0  ;;  %vm1627_vm11 = vcmask 261120  }
 0x1c3   : > { %v4696_v20 = vld [vmem:[%s591_s30 + $0x8] sm:%s3289_s20]  ;;  %v4700_v21 = vld [vmem:[%s591_s30] sm:%s3289_s20]  ;;  %1556 = vst.msk [vmem:[#allocation3 + $0x30] sm:$0x1] %vm1552_vm12, %v3793_v0  ;;  %1557 = vst.msk [vmem:[#allocation3 + $0x40] sm:$0x1] %vm1552_vm12, %v3793_v0 }
 0x1c4   : > { %739 = vrot.lane.b32.xlu1 %v4588_v6, %s3795_s26  ;;  %726 = vrot.lane.b32.xlu0 %v4588_v6, %s3796_s23  ;;  %s3295_s4 = scalar_select %p906_p6, 0, 255  ;;  %1558 = vst.msk [vmem:[#allocation3 + $0x50] sm:$0x1] %vm1552_vm12, %v3793_v0  ;;  %vm1679_vm12 = vcmask 785920  }
 0x1c5   : > { %s3798_s30 = smov 64   ;;  %s5018_s9 = scalar_lea.vmem [#allocation20], %s2488_s17 }
 0x1c6   : > { %v4717_v22 = vld [vmem:[%s600_s16 + $0x8] sm:%s3295_s4]  ;;  %v4721_v23 = vld [vmem:[%s600_s16] sm:%s3295_s4]  ;;  %p2542_p8 = scmp.ne.s32.totalorder %s5372_s29, 0 }
 0x1c8   : > { %762 = vrot.lane.b32.xlu1 %v4605_v7, %s3796_s23  ;;  %760 = vrot.lane.b32.xlu0 %v4617_v8, %s3796_s23 }
 0x1cc   : > { %773 = vrot.lane.b32.xlu1 %v4605_v7, %s3795_s26  ;;  %771 = vrot.lane.b32.xlu0 %v4617_v8, %s3795_s26 }
 0x1d0   : > { %797 = vrot.lane.b32.xlu1 %v4632_v9, %s3796_s23  ;;  %795 = vrot.lane.b32.xlu0 %v4635_v10, %s3796_s23 }
 0x1d4   : > { %838 = vrot.lane.b32.xlu1 %v4632_v9, %s3795_s26  ;;  %836 = vrot.lane.b32.xlu0 %v4635_v10, %s3795_s26 }
 0x1d8   : > { %801 = vrot.lane.b32.xlu1 %v4646_v13, %s3796_s23  ;;  %799 = vrot.lane.b32.xlu0 %v4649_v14, %s3796_s23 }
 0x1dc   : > { %842 = vrot.lane.b32.xlu1 %v4646_v13, %s3795_s26  ;;  %840 = vrot.lane.b32.xlu0 %v4649_v14, %s3795_s26 }
 0x1e0   : > { %805 = vrot.lane.b32.xlu1 %v4665_v16, %s3796_s23  ;;  %803 = vrot.lane.b32.xlu0 %v4668_v17, %s3796_s23 }
 0x1e4   : > { %846 = vrot.lane.b32.xlu1 %v4665_v16, %s3795_s26  ;;  %844 = vrot.lane.b32.xlu0 %v4668_v17, %s3795_s26 }
 0x1e8   : > { %809 = vrot.lane.b32.xlu1 %v4679_v18, %s3796_s23  ;;  %807 = vrot.lane.b32.xlu0 %v4682_v19, %s3796_s23 }
 0x1ec   : > { %850 = vrot.lane.b32.xlu1 %v4679_v18, %s3795_s26  ;;  %848 = vrot.lane.b32.xlu0 %v4682_v19, %s3795_s26 }
 0x1f0   : > { %884 = vrot.lane.b32.xlu1 %v4696_v20, %s3796_s23  ;;  %882 = vrot.lane.b32.xlu0 %v4700_v21, %s3796_s23 }
 0x1f4   : > { %895 = vrot.lane.b32.xlu1 %v4696_v20, %s3795_s26  ;;  %893 = vrot.lane.b32.xlu0 %v4700_v21, %s3795_s26 }
 0x1f8   : > { %916 = vrot.lane.b32.xlu1 %v4717_v22, %s3796_s23  ;;  %914 = vrot.lane.b32.xlu0 %v4721_v23, %s3796_s23 }
 0x1fc   : > { %927 = vrot.lane.b32.xlu1 %v4717_v22, %s3795_s26  ;;  %925 = vrot.lane.b32.xlu0 %v4721_v23, %s3795_s26 }
 0x232   : > { %v738_v24 = vpop.permute.xlu1 %737  ;;  %v725_v25 = vpop.permute.xlu0 %724 }
 0x233   : > { %731 = vst.msk [vmem:[#allocation2] sm:$0xff] %vm730_vm5, %v725_v25 }
 0x236   : > { %v740_v26 = vpop.permute.xlu1 %739  ;;  %v727_v27 = vpop.permute.xlu0 %726 }
 0x237   : > { %732 = vst.msk [vmem:[#allocation2 + $0x8] sm:$0xff] %vm730_vm5, %v727_v27 }
 0x238   : > { %734 = vst.msk [vmem:[#allocation2 + $0x1] sm:$0xff] %vm733_vm6, %v4571_v5 }
 0x239   : > { %736 = vst.msk [vmem:[#allocation2 + $0x9] sm:$0x7f] %vm735_vm7, %v4588_v6 }
 0x23a   : > { %744 = vst.msk [vmem:[#allocation2 - $0x1] sm:$0xfe] %vm743_vm8, %v738_v24  ;;  %v763_v28 = vpop.permute.xlu1 %762  ;;  %v761_v29 = vpop.permute.xlu0 %760 }
 0x23b   : > { %746 = vst.msk [vmem:[#allocation2 + $0x7] sm:$0xff] %vm745_vm9, %v740_v26 }
 0x23c   : > { %768 = vst.msk [vmem:[#allocation2 + $0x18] sm:$0xff] %vm730_vm5, %v763_v28  ;;  %767 = vst.msk [vmem:[#allocation2 + $0x10] sm:$0xff] %vm730_vm5, %v761_v29 }
 0x23d   : > { %770 = vst.msk [vmem:[#allocation2 + $0x19] sm:$0x7f] %vm735_vm7, %v4605_v7 }
 0x23e   : > { %769 = vst.msk [vmem:[#allocation2 + $0x11] sm:$0xff] %vm733_vm6, %v4617_v8  ;;  %v774_v32 = vpop.permute.xlu1 %773  ;;  %v772_v33 = vpop.permute.xlu0 %771 }
 0x23f   : > { %778 = vst.msk [vmem:[#allocation2 + $0x17] sm:$0xff] %vm745_vm9, %v774_v32 }
 0x240   : > { %777 = vst.msk [vmem:[#allocation2 + $0xf] sm:$0xfe] %vm743_vm8, %v772_v33 }
 0x242   : > { %v940_v34 = vld [vmem:[#allocation2] sm:$0xff]  ;;  %v941_v35 = vld [vmem:[#allocation2 + $0x8] sm:$0xff]  ;;  %v798_v37 = vpop.permute.xlu1 %797  ;;  %v796_v38 = vpop.permute.xlu0 %795 }
 0x243   : > { %2698 = vmatprep.mubr.msk.f32.mxu0 %vm954_vm10, %v940_v34  ;;  %821 = vst.msk [vmem:[#allocation2 + $0x28] sm:$0xff] %vm730_vm5, %v798_v37  ;;  %820 = vst.msk [vmem:[#allocation2 + $0x20] sm:$0xff] %vm730_vm5, %v796_v38 }
 0x244   : > { %2699 = vmatmul.mubr.msk.f32.vlgmr.msra.gmra.mrb[0].mxu0 %vm954_vm10, %v941_v35  ;;  %829 = vst.msk [vmem:[#allocation2 + $0x29] sm:$0x7f] %vm735_vm7, %v4632_v9 }
 0x245   : > { %2879 = vmatpush3.bf16.msk.msra.mxu0 %vm4565_vm4, %v4651_v15  ;;  %828 = vst.msk [vmem:[#allocation2 + $0x21] sm:$0xff] %vm733_vm6, %v4635_v10 }
 0x246   : > { %2882 = vmatprep.subr.msk.bf16.mxu0 %vm4565_vm4, %v4747_v36  ;;  %v839_v39 = vpop.permute.xlu1 %838  ;;  %v837_v40 = vpop.permute.xlu0 %836  ;;  %v4763_v42 = vld [vmem:[#allocation2 + $0x18] sm:$0xff] }
 0x247   : > { %v942_v41 = vld [vmem:[#allocation2 + $0x10] sm:$0xff]  ;;  %861 = vst.msk [vmem:[#allocation2 + $0x27] sm:$0xff] %vm745_vm9, %v839_v39 }
 0x248   : > { %860 = vst.msk [vmem:[#allocation2 + $0x1f] sm:$0xfe] %vm743_vm8, %v837_v40  ;;  %2701 = vmatprep.mubr.msk.f32.mxu0 %vm954_vm10, %v942_v41 }
 0x249   : > { %2702 = vmatmul.mubr.msk.f32.gmra.mrb[2].mxu0 %vm954_vm10, %v4763_v42 }
 0x24a   : > { %v802_v43 = vpop.permute.xlu1 %801  ;;  %v800_v44 = vpop.permute.xlu0 %799 }
 0x24b   : > { %823 = vst.msk [vmem:[#allocation2 + $0x38] sm:$0xff] %vm730_vm5, %v802_v43  ;;  %822 = vst.msk [vmem:[#allocation2 + $0x30] sm:$0xff] %vm730_vm5, %v800_v44 }
 0x24c   : > { %831 = vst.msk [vmem:[#allocation2 + $0x39] sm:$0x7f] %vm735_vm7, %v4646_v13 }
 0x24d   : > { %830 = vst.msk [vmem:[#allocation2 + $0x31] sm:$0xff] %vm733_vm6, %v4649_v14  ;;  %v4870_v14 = vstv %s1514_s21 }
 0x24e   : > { %v843_v45 = vpop.permute.xlu1 %842  ;;  %v841_v46 = vpop.permute.xlu0 %840  ;;  %v4778_v48 = vld [vmem:[#allocation2 + $0x28] sm:$0xff] }
 0x24f   : > { %v4776_v47 = vld [vmem:[#allocation2 + $0x20] sm:$0xff]  ;;  %863 = vst.msk [vmem:[#allocation2 + $0x37] sm:$0xff] %vm745_vm9, %v843_v45 }
 0x250   : > { %862 = vst.msk [vmem:[#allocation2 + $0x2f] sm:$0xfe] %vm743_vm8, %v841_v46  ;;  %2704 = vmatprep.mubr.msk.f32.mxu0 %vm954_vm10, %v4776_v47 }
 0x251   : > { %2705 = vmatmul.mubr.msk.f32.gmra.mrb[4].mxu0 %vm954_vm10, %v4778_v48 }
 0x252   : > { %v806_v49 = vpop.permute.xlu1 %805  ;;  %v804_v50 = vpop.permute.xlu0 %803 }
 0x253   : > { %825 = vst.msk [vmem:[#allocation2 + $0x48] sm:$0xff] %vm730_vm5, %v806_v49  ;;  %824 = vst.msk [vmem:[#allocation2 + $0x40] sm:$0xff] %vm730_vm5, %v804_v50 }
 0x254   : > { %833 = vst.msk [vmem:[#allocation2 + $0x49] sm:$0x7f] %vm735_vm7, %v4665_v16 }
 0x255   : > { %832 = vst.msk [vmem:[#allocation2 + $0x41] sm:$0xff] %vm733_vm6, %v4668_v17 }
 0x256   : > { %v847_v51 = vpop.permute.xlu1 %846  ;;  %v845_v52 = vpop.permute.xlu0 %844  ;;  %v947_v54 = vld [vmem:[#allocation2 + $0x38] sm:$0xff] }
 0x257   : > { %v946_v53 = vld [vmem:[#allocation2 + $0x30] sm:$0xff]  ;;  %865 = vst.msk [vmem:[#allocation2 + $0x47] sm:$0xff] %vm745_vm9, %v847_v51 }
 0x258   : > { %864 = vst.msk [vmem:[#allocation2 + $0x3f] sm:$0xfe] %vm743_vm8, %v845_v52  ;;  %2707 = vmatprep.mubr.msk.f32.mxu0 %vm954_vm10, %v946_v53 }
 0x259   : > { %2708 = vmatmul.mubr.msk.f32.gmra.mrb[6].mxu0 %vm954_vm10, %v947_v54 }
 0x25a   : > { %v810_v55 = vpop.permute.xlu1 %809  ;;  %v808_v56 = vpop.permute.xlu0 %807 }
 0x25b   : > { %827 = vst.msk [vmem:[#allocation2 + $0x58] sm:$0xff] %vm730_vm5, %v810_v55  ;;  %826 = vst.msk [vmem:[#allocation2 + $0x50] sm:$0xff] %vm730_vm5, %v808_v56 }
 0x25c   : > { %835 = vst.msk [vmem:[#allocation2 + $0x59] sm:$0x7f] %vm735_vm7, %v4679_v18 }
 0x25d   : > { %834 = vst.msk [vmem:[#allocation2 + $0x51] sm:$0xff] %vm733_vm6, %v4682_v19 }
 0x25e   : > { %v851_v57 = vpop.permute.xlu1 %850  ;;  %v849_v58 = vpop.permute.xlu0 %848  ;;  %v949_v60 = vld [vmem:[#allocation2 + $0x48] sm:$0xff] }
 0x25f   : > { %v948_v59 = vld [vmem:[#allocation2 + $0x40] sm:$0xff]  ;;  %867 = vst.msk [vmem:[#allocation2 + $0x57] sm:$0xff] %vm745_vm9, %v851_v57 }
 0x260   : > { %866 = vst.msk [vmem:[#allocation2 + $0x4f] sm:$0xfe] %vm743_vm8, %v849_v58  ;;  %2710 = vmatprep.mubr.msk.f32.mxu0 %vm954_vm10, %v948_v59 }
 0x261   : > { %2711 = vmatmul.mubr.msk.f32.gmra.mrb[8].mxu0 %vm954_vm10, %v949_v60 }
 0x262   : > { %v885_v61 = vpop.permute.xlu1 %884  ;;  %v883_v62 = vpop.permute.xlu0 %882 }
 0x263   : > { %890 = vst.msk [vmem:[#allocation2 + $0x68] sm:$0xff] %vm730_vm5, %v885_v61  ;;  %889 = vst.msk [vmem:[#allocation2 + $0x60] sm:$0xff] %vm730_vm5, %v883_v62 }
 0x264   : > { %892 = vst.msk [vmem:[#allocation2 + $0x69] sm:$0x7f] %vm735_vm7, %v4696_v20 }
 0x265   : > { %891 = vst.msk [vmem:[#allocation2 + $0x61] sm:$0xff] %vm733_vm6, %v4700_v21 }
 0x266   : > { %v951_v1 = vld [vmem:[#allocation2 + $0x58] sm:$0xff]  ;;  %v896_v2 = vpop.permute.xlu1 %895  ;;  %v894_v3 = vpop.permute.xlu0 %893 }
 0x267   : > { %v950_v63 = vld [vmem:[#allocation2 + $0x50] sm:$0xff]  ;;  %900 = vst.msk [vmem:[#allocation2 + $0x67] sm:$0xff] %vm745_vm9, %v896_v2 }
 0x268   : > { %2713 = vmatprep.mubr.msk.f32.mxu0 %vm954_vm10, %v950_v63  ;;  %899 = vst.msk [vmem:[#allocation2 + $0x5f] sm:$0xfe] %vm743_vm8, %v894_v3 }
 0x269   : > { %2714 = vmatmul.mubr.msk.f32.gmra.mrb[10].mxu0 %vm954_vm10, %v951_v1 }
 0x26a   : > { %2720 = vmatprep.mubr.msk.f32.mxu0 %vm954_vm10, %v942_v41  ;;  %v917_v5 = vpop.permute.xlu1 %916  ;;  %v915_v6 = vpop.permute.xlu0 %914 }
 0x26b   : > { %922 = vst.msk [vmem:[#allocation2 + $0x78] sm:$0xff] %vm730_vm5, %v917_v5  ;;  %921 = vst.msk [vmem:[#allocation2 + $0x70] sm:$0xff] %vm730_vm5, %v915_v6 }
 0x26c   : > { %924 = vst.msk [vmem:[#allocation2 + $0x79] sm:$0x7f] %vm735_vm7, %v4717_v22 }
 0x26d   : > { %2721 = vmatmul.mubr.msk.f32.vlgmr.msra.gmra.mrb[0].mxu0 %vm954_vm10, %v4763_v42  ;;  %923 = vst.msk [vmem:[#allocation2 + $0x71] sm:$0xff] %vm733_vm6, %v4721_v23 }
 0x26e   : > { %2885 = vmatpush3.bf16.msk.msra.mxu0 %vm4565_vm4, %v4747_v36  ;;  %2723 = vmatprep.mubr.msk.f32.mxu0 %vm954_vm10, %v4776_v47  ;;  %v928_v7 = vpop.permute.xlu1 %927  ;;  %v926_v8 = vpop.permute.xlu0 %925  ;;  %v1143_v9 = vld [vmem:[#allocation2 + $0x68] sm:$0xff] }
 0x26f   : > { %932 = vst.msk [vmem:[#allocation2 + $0x77] sm:$0xff] %vm745_vm9, %v928_v7  ;;  %v1142_v4 = vld [vmem:[#allocation2 + $0x60] sm:$0xff]  ;;  %vm1614_vm9 = vcmask 523520  }
 0x270   : > { %931 = vst.msk [vmem:[#allocation2 + $0x6f] sm:$0xfe] %vm743_vm8, %v926_v8 }
 0x271   : > { %2724 = vmatmul.mubr.msk.f32.gmra.mrb[2].mxu0 %vm954_vm10, %v4778_v48 }
 0x272   : > { %2726 = vmatprep.mubr.msk.f32.mxu0 %vm954_vm10, %v946_v53 }
 0x275   : > { %2727 = vmatmul.mubr.msk.f32.gmra.mrb[4].mxu0 %vm954_vm10, %v947_v54 }
 0x276   : > { %2729 = vmatprep.mubr.msk.f32.mxu0 %vm954_vm10, %v948_v59  ;;  %v1334_v11 = vld [vmem:[#allocation2 + $0x78] sm:$0xff] }
 0x277   : > { %v1333_v10 = vld [vmem:[#allocation2 + $0x70] sm:$0xff] }
 0x279   : > { %2730 = vmatmul.mubr.msk.f32.gmra.mrb[6].mxu0 %vm954_vm10, %v949_v60 }
 0x27a   : > { %2732 = vmatprep.mubr.msk.f32.mxu0 %vm954_vm10, %v950_v63 }
 0x27d   : > { %2733 = vmatmul.mubr.msk.f32.gmra.mrb[8].mxu0 %vm954_vm10, %v951_v1 }
 0x27e   : > { %2735 = vmatprep.mubr.msk.f32.mxu0 %vm954_vm10, %v1142_v4 }
 0x281   : > { %2736 = vmatmul.mubr.msk.f32.gmra.mrb[10].mxu0 %vm954_vm10, %v1143_v9 }
 0x282   : > { %2742 = vmatprep.mubr.msk.f32.mxu0 %vm954_vm10, %v4776_v47 }
 0x285   : > { %2743 = vmatmul.mubr.msk.f32.vlgmr.msra.gmra.mrb[0].mxu0 %vm954_vm10, %v4778_v48 }
 0x286   : > { %2745 = vmatprep.mubr.msk.f32.mxu0 %vm954_vm10, %v946_v53 }
 0x289   : > { %2746 = vmatmul.mubr.msk.f32.gmra.mrb[2].mxu0 %vm954_vm10, %v947_v54 }
 0x28a   : > { %2748 = vmatprep.mubr.msk.f32.mxu0 %vm954_vm10, %v948_v59 }
 0x28d   : > { %2749 = vmatmul.mubr.msk.f32.gmra.mrb[4].mxu0 %vm954_vm10, %v949_v60 }
 0x28e   : > { %2751 = vmatprep.mubr.msk.f32.mxu0 %vm954_vm10, %v950_v63 }
 0x291   : > { %2752 = vmatmul.mubr.msk.f32.gmra.mrb[6].mxu0 %vm954_vm10, %v951_v1 }
 0x292   : > { %2754 = vmatprep.mubr.msk.f32.mxu0 %vm954_vm10, %v1142_v4 }
 0x295   : > { %2755 = vmatmul.mubr.msk.f32.gmra.mrb[8].mxu0 %vm954_vm10, %v1143_v9 }
 0x296   : > { %2757 = vmatprep.mubr.msk.f32.mxu0 %vm954_vm10, %v1333_v10 }
 0x299   : > { %2758 = vmatmul.mubr.msk.f32.gmra.mrb[10].mxu0 %vm954_vm10, %v1334_v11  ;;  %vm1629_vm10 = vcmask 260096  }
 0x358   : > { %v2744_v13 = vpop.f32.mrb[0].mxu0 }
 0x359   : > { %v2970_v15 = vadd.f32 %v2744_v13, %v4868_v12  ;;  %v1443_v16 = vpop.f32.mrb[1].mxu0 }
 0x35a   : > { %v2971_v17 = vadd.f32 %v4868_v12, %v1443_v16 }
 0x35b   : > { %v1529_v18 = vmul.f32 %v2970_v15, %v4870_v14  ;;  %vm1516_vm13 = vcmp.ge.f32.partialorder %v2970_v15, 0.0 }
 0x35c   : > { %v1528_v19 = vmul.f32 %v2971_v17, %v4870_v14  ;;  %v2747_v20 = vpop.f32.mrb[2].mxu0  ;;  %vm1515_vm14 = vcmp.ge.f32.partialorder %v2971_v17, 0.0 }
 0x35d   : > { %v2972_v21 = vadd.f32 %v2747_v20, %v4868_v12  ;;  %v1453_v0 = vpop.f32.mrb[3].mxu0  ;;  %v4877_v22 = vsel %vm1516_vm13, %v2970_v15, %v1529_v18  ;;  %vm1677_vm13 = vcmask 785921  }
 0x35e   : > { %v2973_v23 = vadd.f32 %v4868_v12, %v1453_v0  ;;  %1580 = vrot.lane.b32.xlu1 %v4877_v22, %s3797_s18  ;;  %v4882_v24 = vsel %vm1515_vm14, %v2971_v17, %v1528_v19  ;;  %vm1695_vm14 = vcmask (!%p2542_p8), 785408   ;;  %v3799_v0 = vmov (!%p2542_p8), 0.0  }
 0x35f   : > { %1578 = vrot.lane.b32.xlu0 %v4882_v24, %s3797_s18  ;;  %v1531_v26 = vmul.f32 %v2972_v21, %v4870_v14  ;;  %vm1518_vm15 = vcmp.ge.f32.partialorder %v2972_v21, 0.0 }
 0x360   : > { %v2750_v25 = vpop.f32.mrb[4].mxu0  ;;  %v1530_v28 = vmul.f32 %v2973_v23, %v4870_v14  ;;  %vm1517_vm0 = vcmp.ge.f32.partialorder %v2973_v23, 0.0 }
 0x361   : > { %v1463_v27 = vpop.f32.mrb[5].mxu0  ;;  %v2974_v30 = vadd.f32 %v2750_v25, %v4868_v12  ;;  %v4893_v32 = vsel %vm1518_vm15, %v2972_v21, %v1531_v26 }
 0x362   : > { %1643 = vrot.lane.b32.xlu1 %v4877_v22, %s3798_s30  ;;  %v2975_v33 = vadd.f32 %v4868_v12, %v1463_v27  ;;  %v4898_v34 = vsel %vm1517_vm0, %v2973_v23, %v1530_v28 }
 0x363   : > { %1641 = vrot.lane.b32.xlu0 %v4882_v24, %s3798_s30  ;;  %v1533_v36 = vmul.f32 %v2974_v30, %v4870_v14  ;;  %vm1520_vm1 = vcmp.ge.f32.partialorder %v2974_v30, 0.0 }
 0x364   : > { %v2753_v29 = vpop.f32.mrb[6].mxu0  ;;  %v1532_v38 = vmul.f32 %v2975_v33, %v4870_v14  ;;  %vm1519_vm2 = vcmp.ge.f32.partialorder %v2975_v33, 0.0 }
 0x365   : > { %v1473_v31 = vpop.f32.mrb[7].mxu0  ;;  %v2976_v40 = vadd.f32 %v2753_v29, %v4868_v12  ;;  %v4909_v42 = vsel %vm1520_vm1, %v2974_v30, %v1533_v36 }
 0x366   : > { %1584 = vrot.lane.b32.xlu1 %v4893_v32, %s3797_s18  ;;  %v2977_v43 = vadd.f32 %v4868_v12, %v1473_v31  ;;  %v4914_v44 = vsel %vm1519_vm2, %v2975_v33, %v1532_v38 }
 0x367   : > { %1582 = vrot.lane.b32.xlu0 %v4898_v34, %s3797_s18  ;;  %v1535_v45 = vmul.f32 %v2976_v40, %v4870_v14  ;;  %vm1522_vm3 = vcmp.ge.f32.partialorder %v2976_v40, 0.0 }
 0x368   : > { %v2756_v35 = vpop.f32.mrb[8].mxu0  ;;  %v1534_v46 = vmul.f32 %v2977_v43, %v4870_v14  ;;  %vm1521_vm4 = vcmp.ge.f32.partialorder %v2977_v43, 0.0 }
 0x369   : > { %v1483_v37 = vpop.f32.mrb[9].mxu0  ;;  %v2978_v47 = vadd.f32 %v2756_v35, %v4868_v12  ;;  %v4925_v48 = vsel %vm1522_vm3, %v2976_v40, %v1535_v45 }
 0x36a   : > { %1647 = vrot.lane.b32.xlu1 %v4893_v32, %s3798_s30  ;;  %v2979_v49 = vadd.f32 %v4868_v12, %v1483_v37  ;;  %v4930_v50 = vsel %vm1521_vm4, %v2977_v43, %v1534_v46 }
 0x36b   : > { %1645 = vrot.lane.b32.xlu0 %v4898_v34, %s3798_s30  ;;  %v1537_v51 = vmul.f32 %v2978_v47, %v4870_v14  ;;  %vm1524_vm5 = vcmp.ge.f32.partialorder %v2978_v47, 0.0 }
 0x36c   : > { %v2759_v39 = vpop.f32.mrb[10].mxu0  ;;  %v1536_v52 = vmul.f32 %v2979_v49, %v4870_v14  ;;  %vm1523_vm6 = vcmp.ge.f32.partialorder %v2979_v49, 0.0 }
 0x36d   : > { %v1493_v41 = vpop.f32.mrb[11].mxu0  ;;  %v2980_v53 = vadd.f32 %v2759_v39, %v4868_v12  ;;  %v4941_v54 = vsel %vm1524_vm5, %v2978_v47, %v1537_v51 }
 0x36e   : > { %1588 = vrot.lane.b32.xlu1 %v4909_v42, %s3797_s18  ;;  %v2981_v55 = vadd.f32 %v4868_v12, %v1493_v41  ;;  %v4946_v56 = vsel %vm1523_vm6, %v2979_v49, %v1536_v52 }
 0x36f   : > { %1586 = vrot.lane.b32.xlu0 %v4914_v44, %s3797_s18  ;;  %v1539_v57 = vmul.f32 %v2980_v53, %v4870_v14  ;;  %vm1526_vm7 = vcmp.ge.f32.partialorder %v2980_v53, 0.0 }
 0x370   : > { %v1538_v58 = vmul.f32 %v2981_v55, %v4870_v14  ;;  %vm1525_vm8 = vcmp.ge.f32.partialorder %v2981_v55, 0.0 }
 0x371   : > { %v4956_v59 = vsel %vm1526_vm7, %v2980_v53, %v1539_v57 }
 0x372   : > { %1651 = vrot.lane.b32.xlu1 %v4909_v42, %s3798_s30  ;;  %v4960_v60 = vsel %vm1525_vm8, %v2981_v55, %v1538_v58 }
 0x373   : > { %1649 = vrot.lane.b32.xlu0 %v4914_v44, %s3798_s30 }
 0x376   : > { %1592 = vrot.lane.b32.xlu1 %v4925_v48, %s3797_s18 }
 0x377   : > { %1590 = vrot.lane.b32.xlu0 %v4930_v50, %s3797_s18 }
 0x37a   : > { %1655 = vrot.lane.b32.xlu1 %v4925_v48, %s3798_s30 }
 0x37b   : > { %1653 = vrot.lane.b32.xlu0 %v4930_v50, %s3798_s30 }
 0x37e   : > { %1596 = vrot.lane.b32.xlu1 %v4941_v54, %s3797_s18 }
 0x37f   : > { %1594 = vrot.lane.b32.xlu0 %v4946_v56, %s3797_s18 }
 0x382   : > { %1659 = vrot.lane.b32.xlu1 %v4941_v54, %s3798_s30 }
 0x383   : > { %1657 = vrot.lane.b32.xlu0 %v4946_v56, %s3798_s30 }
 0x386   : > { %1600 = vrot.lane.b32.xlu1 %v4956_v59, %s3797_s18 }
 0x387   : > { %1598 = vrot.lane.b32.xlu0 %v4960_v60, %s3797_s18 }
 0x38a   : > { %1663 = vrot.lane.b32.xlu1 %v4956_v59, %s3798_s30 }
 0x38b   : > { %1661 = vrot.lane.b32.xlu0 %v4960_v60, %s3798_s30 }
 0x3d0   : > { %v1581_v61 = vpop.permute.xlu1 %1580 }
 0x3d1   : > { %1616 = vst.msk [vmem:[#allocation3 + $0x8] sm:$0xff] %vm1614_vm9, %v1581_v61  ;;  %v1579_v62 = vpop.permute.xlu0 %1578 }
 0x3d2   : > { %1630 = vst.msk [vmem:[#allocation3 + $0x9] sm:$0x7f] %vm1629_vm10, %v4877_v22 }
 0x3d3   : > { %1615 = vst.msk [vmem:[#allocation3] sm:$0xff] %vm1614_vm9, %v1579_v62 }
 0x3d4   : > { %1628 = vst.msk [vmem:[#allocation3 + $0x1] sm:$0xff] %vm1627_vm11, %v4882_v24  ;;  %v1644_v63 = vpop.permute.xlu1 %1643 }
 0x3d5   : > { %1680 = vst.msk [vmem:[#allocation3 + $0x7] sm:$0xff] %vm1679_vm12, %v1644_v63  ;;  %v1642_v1 = vpop.permute.xlu0 %1641 }
 0x3d6   : > { %1678 = vst.msk [vmem:[#allocation3 - $0x1] sm:$0xfe] %vm1677_vm13, %v1642_v1 }
 0x3d7   : > { %1696 = vst.msk [vmem:[#allocation3] sm:$0xff] (!%p2542_p8), %vm1695_vm14, %v3799_v0  ;;  %1697 = vst.msk [vmem:[#allocation3 + $0x8] sm:$0xff] (!%p2542_p8), %vm1695_vm14, %v3799_v0 }
 0x3d8   : > { %v1585_v2 = vpop.permute.xlu1 %1584 }
 0x3d9   : > { %1618 = vst.msk [vmem:[#allocation3 + $0x18] sm:$0xff] %vm1614_vm9, %v1585_v2  ;;  %v1583_v3 = vpop.permute.xlu0 %1582 }
 0x3da   : > { %1632 = vst.msk [vmem:[#allocation3 + $0x19] sm:$0x7f] %vm1629_vm10, %v4893_v32 }
 0x3db   : > { %1617 = vst.msk [vmem:[#allocation3 + $0x10] sm:$0xff] %vm1614_vm9, %v1583_v3 }
 0x3dc   : > { %1631 = vst.msk [vmem:[#allocation3 + $0x11] sm:$0xff] %vm1627_vm11, %v4898_v34  ;;  %v1648_v5 = vpop.permute.xlu1 %1647 }
 0x3dd   : > { %1682 = vst.msk [vmem:[#allocation3 + $0x17] sm:$0xff] %vm1679_vm12, %v1648_v5  ;;  %v1646_v6 = vpop.permute.xlu0 %1645 }
 0x3de   : > { %1681 = vst.msk [vmem:[#allocation3 + $0xf] sm:$0xfe] %vm1677_vm13, %v1646_v6 }
 0x3e0   : > { %v1589_v7 = vpop.permute.xlu1 %1588 }
 0x3e1   : > { %1620 = vst.msk [vmem:[#allocation3 + $0x28] sm:$0xff] %vm1614_vm9, %v1589_v7  ;;  %v1587_v8 = vpop.permute.xlu0 %1586 }
 0x3e2   : > { %1634 = vst.msk [vmem:[#allocation3 + $0x29] sm:$0x7f] %vm1629_vm10, %v4909_v42 }
 0x3e3   : > { %1619 = vst.msk [vmem:[#allocation3 + $0x20] sm:$0xff] %vm1614_vm9, %v1587_v8 }
 0x3e4   : > { %1633 = vst.msk [vmem:[#allocation3 + $0x21] sm:$0xff] %vm1627_vm11, %v4914_v44  ;;  %v1652_v4 = vpop.permute.xlu1 %1651 }
 0x3e5   : > { %1684 = vst.msk [vmem:[#allocation3 + $0x27] sm:$0xff] %vm1679_vm12, %v1652_v4  ;;  %v1650_v9 = vpop.permute.xlu0 %1649 }
 0x3e6   : > { %1683 = vst.msk [vmem:[#allocation3 + $0x1f] sm:$0xfe] %vm1677_vm13, %v1650_v9 }
 0x3e8   : > { %v1593_v10 = vpop.permute.xlu1 %1592 }
 0x3e9   : > { %1622 = vst.msk [vmem:[#allocation3 + $0x38] sm:$0xff] %vm1614_vm9, %v1593_v10  ;;  %v1591_v11 = vpop.permute.xlu0 %1590 }
 0x3ea   : > { %1636 = vst.msk [vmem:[#allocation3 + $0x39] sm:$0x7f] %vm1629_vm10, %v4925_v48 }
 0x3eb   : > { %1621 = vst.msk [vmem:[#allocation3 + $0x30] sm:$0xff] %vm1614_vm9, %v1591_v11 }
 0x3ec   : > { %1635 = vst.msk [vmem:[#allocation3 + $0x31] sm:$0xff] %vm1627_vm11, %v4930_v50  ;;  %v1656_v12 = vpop.permute.xlu1 %1655 }
 0x3ed   : > { %1686 = vst.msk [vmem:[#allocation3 + $0x37] sm:$0xff] %vm1679_vm12, %v1656_v12  ;;  %v1654_v13 = vpop.permute.xlu0 %1653 }
 0x3ee   : > { %1685 = vst.msk [vmem:[#allocation3 + $0x2f] sm:$0xfe] %vm1677_vm13, %v1654_v13 }
 0x3f0   : > { %v1597_v14 = vpop.permute.xlu1 %1596 }
 0x3f1   : > { %1624 = vst.msk [vmem:[#allocation3 + $0x48] sm:$0xff] %vm1614_vm9, %v1597_v14  ;;  %v1595_v15 = vpop.permute.xlu0 %1594 }
 0x3f2   : > { %1638 = vst.msk [vmem:[#allocation3 + $0x49] sm:$0x7f] %vm1629_vm10, %v4941_v54 }
 0x3f3   : > { %1623 = vst.msk [vmem:[#allocation3 + $0x40] sm:$0xff] %vm1614_vm9, %v1595_v15 }
 0x3f4   : > { %1637 = vst.msk [vmem:[#allocation3 + $0x41] sm:$0xff] %vm1627_vm11, %v4946_v56  ;;  %v1660_v16 = vpop.permute.xlu1 %1659 }
 0x3f5   : > { %1688 = vst.msk [vmem:[#allocation3 + $0x47] sm:$0xff] %vm1679_vm12, %v1660_v16  ;;  %v1658_v17 = vpop.permute.xlu0 %1657 }
 0x3f6   : > { %1687 = vst.msk [vmem:[#allocation3 + $0x3f] sm:$0xfe] %vm1677_vm13, %v1658_v17 }
 0x3f8   : > { %v1601_v18 = vpop.permute.xlu1 %1600  ;;  %1694 = sbr.rel (%p2542_p8) target bundleno = 1023 (0x3ff), region = 100 }
 0x3f9   : > { %1626 = vst.msk [vmem:[#allocation3 + $0x58] sm:$0xff] %vm1614_vm9, %v1601_v18  ;;  %v1599_v19 = vpop.permute.xlu0 %1598 }
 0x3fa   : > { %1640 = vst.msk [vmem:[#allocation3 + $0x59] sm:$0x7f] %vm1629_vm10, %v4956_v59 }
 0x3fb   : > { %1625 = vst.msk [vmem:[#allocation3 + $0x50] sm:$0xff] %vm1614_vm9, %v1599_v19 }
 0x3fc   : > { %1639 = vst.msk [vmem:[#allocation3 + $0x51] sm:$0xff] %vm1627_vm11, %v4960_v60  ;;  %v1664_v20 = vpop.permute.xlu1 %1663 }
 0x3fd   : > { %1690 = vst.msk [vmem:[#allocation3 + $0x57] sm:$0xff] %vm1679_vm12, %v1664_v20  ;;  %v1662_v21 = vpop.permute.xlu0 %1661 }
 0x3fe   : > { %1689 = vst.msk [vmem:[#allocation3 + $0x4f] sm:$0xfe] %vm1677_vm13, %v1662_v21 }
 0x3ff PF: > { %s5382_s16 = sld [smem:[#allocation41_spill]] }
 0x405   : > { %p2543_p4 = scmp.ne.s32.totalorder %s5382_s16, 3 }
 0x406   : > { %vm1703_vm15 = vcmask (!%p2543_p4), 785408   ;;  %v3800_v22 = vmov (!%p2543_p4), 0.0  }
 0x407   : > { %1701 = sbr.rel (%p2543_p4) target bundleno = 1038 (0x40e), region = 104  ;;  %1704 = vst.msk [vmem:[#allocation3 + $0x50] sm:$0xff] (!%p2543_p4), %vm1703_vm15, %v3800_v22  ;;  %1705 = vst.msk [vmem:[#allocation3 + $0x58] sm:$0xff] (!%p2543_p4), %vm1703_vm15, %v3800_v22 }
 0x40e PF: > { %v1721_v23 = vld [vmem:[#allocation17] sm:$0xff]  ;;  %v1722_v24 = vld [vmem:[#allocation17 + $0x8] sm:$0xff]  ;;  %v1723_v25 = vld [vmem:[#allocation17 + $0x10] sm:$0xff]  ;;  %vm1733_vm0 = vcmask 785408   ;;  %s5383_s17 = sld [smem:[#allocation41_spill]]  ;;  %s5384_s29 = sld [smem:[#allocation42_spill]] }
 0x40f   : > { %v2886_v26 = vpack.c.bf16 %v1722_v24, %v1721_v23  ;;  %v1724_v27 = vld [vmem:[#allocation17 + $0x18] sm:$0xff]  ;;  %v1725_v29 = vld [vmem:[#allocation17 + $0x20] sm:$0xff]  ;;  %v1726_v30 = vld [vmem:[#allocation17 + $0x28] sm:$0xff]  ;;  %s2214_s12 = sshll.u32 %s5018_s9, 4  ;;  %s5385_s23 = sld [smem:[#allocation62_spill]]  ;;  %s5107_s12 = int_to_ptr.vmem [resolvable:$true] %s2214_s12 }
 0x410   : > { %v2890_v28 = vpack.c.bf16 %v1724_v27, %v1723_v25  ;;  %v1713_v31 = vld [vmem:[#allocation3] sm:$0xff]  ;;  %v2894_v32 = vpack.c.bf16 %v1726_v30, %v1725_v29  ;;  %v2040_v33 = vld [vmem:[#allocation17 + $0xc0] sm:$0xff]  ;;  %v1728_v36 = vld [vmem:[#allocation17 + $0x38] sm:$0xff]  ;;  %s2198_s24 = scalar_lea.sflag [#allocation7], %s4467_s27  ;;  %s3562_s2 = scalar_lea.vmem %s5107_s12, 1024 }
 0x411   : > { %2887 = vmatprep.subr.bf16.mxu1 %v2886_v26  ;;  %2784 = vmatprep.mubr.msk.f32.mxu1 %vm1733_vm0, %v1713_v31  ;;  %v2041_v34 = vld [vmem:[#allocation17 + $0xc8] sm:$0xff]  ;;  %v1727_v35 = vld [vmem:[#allocation17 + $0x30] sm:$0xff]  ;;  %v2043_v39 = vld [vmem:[#allocation17 + $0xd8] sm:$0xff]  ;;  %p3563_p13 = scmp.ne.s32.totalorder %s5107_s12, %s3562_s2  ;;  %p5387_p5 = scmp.ne.s32.totalorder %s5331_s5, 0 }
 0x412   : > { %2889 = vmatpush3.bf16.msra.mxu1 %v2886_v26  ;;  %v5023_v37 = vpack.c.bf16 %v2041_v34, %v2040_v33  ;;  %v2042_v38 = vld [vmem:[#allocation17 + $0xd0] sm:$0xff]  ;;  %v2044_v41 = vld [vmem:[#allocation17 + $0xe0] sm:$0xff]  ;;  %v2045_v42 = vld [vmem:[#allocation17 + $0xe8] sm:$0xff]  ;;  %v2898_v43 = vpack.c.bf16 %v1728_v36, %v1727_v35  ;;  %s3801_s25 = smov [#allocation20]  }
 0x413   : > { %2891 = vmatprep.subr.bf16.mxu1 %v2890_v28  ;;  %v5026_v40 = vpack.c.bf16 %v2043_v39, %v2042_v38  ;;  %v1729_v44 = vld [vmem:[#allocation17 + $0x40] sm:$0xff]  ;;  %v1730_v45 = vld [vmem:[#allocation17 + $0x48] sm:$0xff]  ;;  %v5030_v46 = vpack.c.bf16 %v2045_v42, %v2044_v41  ;;  %v2046_v48 = vld [vmem:[#allocation17 + $0xf0] sm:$0xff]  ;;  %p3564_p12 = pnand %p3563_p13, %p5387_p5  ;;  %s3566_s20 = sshll.u32 %s3801_s25, 4  ;;  %s3567_s20 = int_to_ptr.vmem [resolvable:$false] %s3566_s20 }
 0x414   : > { %2935 = vmatprep.subr.bf16.mxu0 %v5023_v37  ;;  %v5032_v47 = vld [vmem:[#allocation3 + $0x20] sm:$0xff]  ;;  %v2047_v49 = vld [vmem:[#allocation17 + $0xf8] sm:$0xff]  ;;  %v2902_v50 = vpack.c.bf16 %v1730_v45, %v1729_v44  ;;  %v2048_v54 = vld [vmem:[#allocation17 + $0x100] sm:$0xff]  ;;  %s2591_s14 = sshll.u32 %s5383_s17, 3  ;;  %s2572_s8 = sshll.u32 %s5384_s29, 5 }
 0x415   : > { %2937 = vmatpush3.bf16.msra.mxu0 %v5023_v37  ;;  %2856 = vmatprep.mubr.msk.f32.mxu0 %vm1733_vm0, %v5032_v47  ;;  %v1731_v51 = vld [vmem:[#allocation17 + $0x50] sm:$0xff]  ;;  %v1732_v52 = vld [vmem:[#allocation17 + $0x58] sm:$0xff]  ;;  %v5038_v53 = vpack.c.bf16 %v2047_v49, %v2046_v48  ;;  %v2049_v55 = vld [vmem:[#allocation17 + $0x108] sm:$0xff]  ;;  %s2211_s22 = sadd.s32 %s2591_s14, %s2572_s8  ;;  %s5386_s0 = smov %s5385_s23 }
 0x416   : > { %2893 = vmatpush3.bf16.msra.mxu1 %v2890_v28  ;;  %2939 = vmatprep.subr.bf16.mxu0 %v5026_v40  ;;  %v2906_v56 = vpack.c.bf16 %v1732_v52, %v1731_v51  ;;  %v1881_v57 = vld [vmem:[#allocation17 + $0x60] sm:$0xff]  ;;  %v1882_v58 = vld [vmem:[#allocation17 + $0x68] sm:$0xff]  ;;  %v5042_v59 = vpack.c.bf16 %v2049_v55, %v2048_v54  ;;  %v2050_v60 = vld [vmem:[#allocation17 + $0x110] sm:$0xff]  ;;  %s2573_s10 = sshll.u32 %s2211_s22, 7  ;;  %p3565_p9 = pneg %p3564_p12 }
 0x417   : > { %2895 = vmatprep.subr.bf16.mxu1 %v2894_v32  ;;  %v2051_v61 = vld [vmem:[#allocation17 + $0x118] sm:$0xff]  ;;  %v2910_v62 = vpack.c.bf16 %v1882_v58, %v1881_v57  ;;  %v1883_v63 = vld [vmem:[#allocation17 + $0x70] sm:$0xff]  ;;  %v1885_v7 = vld [vmem:[#allocation17 + $0x80] sm:$0xff]  ;;  %s5105_s7 = scalar_lea.hbm %s5385_s23, %s2573_s10  ;;  %s3568_s4 = scalar_lea.vmem %s3567_s20, 2048 }
 0x418   : > { %v1884_v1 = vld [vmem:[#allocation17 + $0x78] sm:$0xff]  ;;  %v5046_v2 = vpack.c.bf16 %v2051_v61, %v2050_v60  ;;  %v1886_v8 = vld [vmem:[#allocation17 + $0x88] sm:$0xff]  ;;  %v1887_v10 = vld [vmem:[#allocation17 + $0x90] sm:$0xff]  ;;  %p3569_p0 = scmp.lt.s32.totalorder %s5107_s12, %s3567_s20  ;;  %p3570_p1 = scmp.lt.s32.totalorder %s3568_s4, %s3562_s2 }
 0x419   : > { %2941 = vmatpush3.bf16.msra.mxu0 %v5026_v40  ;;  %v1714_v3 = vld [vmem:[#allocation3 + $0x8] sm:$0xff]  ;;  %v2914_v5 = vpack.c.bf16 %v1884_v1, %v1883_v63  ;;  %v1715_v6 = vld [vmem:[#allocation3 + $0x10] sm:$0xff]  ;;  %v1716_v4 = vld [vmem:[#allocation3 + $0x18] sm:$0xff]  ;;  %v2918_v9 = vpack.c.bf16 %v1886_v8, %v1885_v7 }
 0x41a   : > { %2897 = vmatpush3.bf16.msra.mxu1 %v2894_v32  ;;  %2943 = vmatprep.subr.bf16.mxu0 %v5030_v46  ;;  %v1888_v11 = vld [vmem:[#allocation17 + $0x98] sm:$0xff]  ;;  %v1889_v15 = vld [vmem:[#allocation17 + $0xa0] sm:$0xff]  ;;  %v1890_v16 = vld [vmem:[#allocation17 + $0xa8] sm:$0xff]  ;;  %p3571_p3 = por %p3570_p1, %p3569_p0 }
 0x41b   : > { %2899 = vmatprep.subr.bf16.mxu1 %v2898_v43  ;;  %v1718_v12 = vld [vmem:[#allocation3 + $0x28] sm:$0xff]  ;;  %v2922_v13 = vpack.c.bf16 %v1888_v11, %v1887_v10  ;;  %v1719_v14 = vld [vmem:[#allocation3 + $0x30] sm:$0xff]  ;;  %v1720_v17 = vld [vmem:[#allocation3 + $0x38] sm:$0xff]  ;;  %v2926_v18 = vpack.c.bf16 %v1890_v16, %v1889_v15 }
 0x41c   : > { %v1891_v19 = vld [vmem:[#allocation17 + $0xb0] sm:$0xff]  ;;  %v1892_v20 = vld [vmem:[#allocation17 + $0xb8] sm:$0xff]  ;;  %v2038_v24 = vld [vmem:[#allocation3 + $0x58] sm:$0xff]  ;;  %p3572_p11 = pnand %p3571_p3, %p3565_p9 }
 0x41d   : > { %2945 = vmatpush3.bf16.msra.mxu0 %v5030_v46  ;;  %v2930_v21 = vpack.c.bf16 %v1892_v20, %v1891_v19  ;;  %v1878_v0 = vld [vmem:[#allocation3 + $0x40] sm:$0xff]  ;;  %v1879_v22 = vld [vmem:[#allocation3 + $0x48] sm:$0xff]  ;;  %v2037_v23 = vld [vmem:[#allocation3 + $0x50] sm:$0xff] }
 0x41e   : > { %2901 = vmatpush3.bf16.msra.mxu1 %v2898_v43  ;;  %2947 = vmatprep.subr.bf16.mxu0 %v5038_v53  ;;  %v2544_v27 = vld [vmem:[#allocation19] ss:$0 sm:$0xff] }
 0x41f   : > { %2903 = vmatprep.subr.bf16.mxu1 %v2902_v50 }
 0x421   : > { %2949 = vmatpush3.bf16.msra.mxu0 %v5038_v53 }
 0x422   : > { %2905 = vmatpush3.bf16.msra.mxu1 %v2902_v50  ;;  %2951 = vmatprep.subr.bf16.mxu0 %v5042_v59 }
 0x423   : > { %2907 = vmatprep.subr.bf16.mxu1 %v2906_v56 }
 0x425   : > { %2953 = vmatpush3.bf16.msra.mxu0 %v5042_v59 }
 0x426   : > { %2909 = vmatpush3.bf16.msra.mxu1 %v2906_v56  ;;  %2955 = vmatprep.subr.bf16.mxu0 %v5046_v2 }
 0x427   : > { %2911 = vmatprep.subr.bf16.mxu1 %v2910_v62 }
 0x429   : > { %2785 = vmatmul.mubr.msk.f32.vlgmr.msra.gmra.mrb[0].mxu1 %vm1733_vm0, %v1714_v3  ;;  %2957 = vmatpush3.bf16.msra.mxu0 %v5046_v2 }
 0x42a   : > { %2913 = vmatpush3.bf16.msra.mxu1 %v2910_v62  ;;  %2787 = vmatprep.mubr.msk.f32.mxu1 %vm1733_vm0, %v1715_v6 }
 0x42b   : > { %2915 = vmatprep.subr.bf16.mxu1 %v2914_v5 }
 0x42c   : > { %2857 = vmatmul.mubr.msk.f32.vlgmr.msra.gmra.mrb[12].mxu0 %vm1733_vm0, %v1718_v12 }
 0x42d   : > { %2788 = vmatmul.mubr.msk.f32.gmra.mrb[2].mxu1 %vm1733_vm0, %v1716_v4 }
 0x42e   : > { %2917 = vmatpush3.bf16.msra.mxu1 %v2914_v5  ;;  %2790 = vmatprep.mubr.msk.f32.mxu1 %vm1733_vm0, %v5032_v47 }
 0x42f   : > { %2919 = vmatprep.subr.bf16.mxu1 %v2918_v9 }
 0x431   : > { %2791 = vmatmul.mubr.msk.f32.gmra.mrb[4].mxu1 %vm1733_vm0, %v1718_v12 }
 0x432   : > { %2921 = vmatpush3.bf16.msra.mxu1 %v2918_v9  ;;  %2793 = vmatprep.mubr.msk.f32.mxu1 %vm1733_vm0, %v1719_v14 }
 0x433   : > { %2923 = vmatprep.subr.bf16.mxu1 %v2922_v13 }
 0x435   : > { %2794 = vmatmul.mubr.msk.f32.gmra.mrb[6].mxu1 %vm1733_vm0, %v1720_v17 }
 0x436   : > { %2925 = vmatpush3.bf16.msra.mxu1 %v2922_v13  ;;  %2820 = vmatprep.mubr.msk.f32.mxu1 %vm1733_vm0, %v1715_v6 }
 0x437   : > { %2927 = vmatprep.subr.bf16.mxu1 %v2926_v18 }
 0x43a   : > { %2929 = vmatpush3.bf16.msra.mxu1 %v2926_v18 }
 0x43b   : > { %2931 = vmatprep.subr.bf16.mxu1 %v2930_v21 }
 0x43e   : > { %2933 = vmatpush3.bf16.msra.mxu1 %v2930_v21 }
 0x43f   : > { %2958 = vmatprep.subr.bf16.mxu1 %v5023_v37 }
 0x441   : > { %2821 = vmatmul.mubr.msk.f32.vlgmr.msra.gmra.mrb[0].mxu1 %vm1733_vm0, %v1716_v4 }
 0x442   : > { %2964 = vmatpush3.bf16.msra.mxu1 %v5023_v37  ;;  %2823 = vmatprep.mubr.msk.f32.mxu1 %vm1733_vm0, %v5032_v47 }
 0x443   : > { %2959 = vmatprep.subr.bf16.mxu1 %v5026_v40 }
 0x445   : > { %2824 = vmatmul.mubr.msk.f32.gmra.mrb[2].mxu1 %vm1733_vm0, %v1718_v12 }
 0x446   : > { %2965 = vmatpush3.bf16.msra.mxu1 %v5026_v40  ;;  %2826 = vmatprep.mubr.msk.f32.mxu1 %vm1733_vm0, %v1719_v14 }
 0x447   : > { %2960 = vmatprep.subr.bf16.mxu1 %v5030_v46 }
 0x449   : > { %2827 = vmatmul.mubr.msk.f32.gmra.mrb[4].mxu1 %vm1733_vm0, %v1720_v17 }
 0x44a   : > { %2966 = vmatpush3.bf16.msra.mxu1 %v5030_v46  ;;  %2829 = vmatprep.mubr.msk.f32.mxu1 %vm1733_vm0, %v1878_v0 }
 0x44b   : > { %2961 = vmatprep.subr.bf16.mxu1 %v5038_v53 }
 0x44d   : > { %2830 = vmatmul.mubr.msk.f32.gmra.mrb[6].mxu1 %vm1733_vm0, %v1879_v22 }
 0x44e   : > { %2967 = vmatpush3.bf16.msra.mxu1 %v5038_v53  ;;  %2859 = vmatprep.mubr.msk.f32.mxu1 %vm1733_vm0, %v1719_v14 }
 0x44f   : > { %2962 = vmatprep.subr.bf16.mxu1 %v5042_v59 }
 0x452   : > { %2968 = vmatpush3.bf16.msra.mxu1 %v5042_v59 }
 0x453   : > { %2963 = vmatprep.subr.bf16.mxu1 %v5046_v2 }
 0x456   : > { %2969 = vmatpush3.bf16.msra.mxu1 %v5046_v2 }
 0x459   : > { %2860 = vmatmul.mubr.msk.f32.vlgmr.msra.gmra.mrb[2].mxu1 %vm1733_vm0, %v1720_v17 }
 0x45a   : > { %2862 = vmatprep.mubr.msk.f32.mxu1 %vm1733_vm0, %v1878_v0 }
 0x45d   : > { %2863 = vmatmul.mubr.msk.f32.gmra.mrb[4].mxu1 %vm1733_vm0, %v1879_v22 }
 0x45e   : > { %2865 = vmatprep.mubr.msk.f32.mxu1 %vm1733_vm0, %v2037_v23 }
 0x461   : > { %2866 = vmatmul.mubr.msk.f32.gmra.mrb[6].mxu1 %vm1733_vm0, %v2038_v24 }
 0x4ff   : > { %v2858_v25 = vpop.f32.mrb[12].mxu0 }
 0x500   : > { %v2142_v26 = vpop.f32.mrb[13].mxu0 }
 0x514   : > { %v2822_v28 = vpop.f32.mrb[0].mxu1 }
 0x515   : > { %v2982_v29 = vadd.f32 %v2822_v28, %v2544_v27  ;;  %v1983_v30 = vpop.f32.mrb[1].mxu1 }
 0x516   : > { %v2984_v31 = vadd.f32 %v2544_v27, %v1983_v30 }
 0x517   : > { %v2983_v32 = vadd.f32 %v2982_v29, %v2858_v25 }
 0x518   : > { %v2985_v33 = vadd.f32 %v2984_v31, %v2142_v26 }
 0x519   : > { %2190 = vst.msk [vmem:[%s5018_s9 + $0x8] sm:$0xff] %vm1627_vm11, %v2983_v32 }
 0x51a   : > { %2189 = vst.msk [vmem:[%s5018_s9] sm:$0xff] %vm1627_vm11, %v2985_v33 }
 0x52c   : > { %v2861_v34 = vpop.f32.mrb[2].mxu1 }
 0x52d   : > { %v2986_v35 = vadd.f32 %v2861_v34, %v2544_v27  ;;  %v2152_v36 = vpop.f32.mrb[3].mxu1 }
 0x52e   : > { %v2987_v37 = vadd.f32 %v2544_v27, %v2152_v36 }
 0x52f   : > { %2192 = vst.msk [vmem:[%s5018_s9 + $0x18] sm:$0xff] %vm1627_vm11, %v2986_v35 }
 0x530   : > { %2191 = vst.msk [vmem:[%s5018_s9 + $0x10] sm:$0xff] %vm1627_vm11, %v2987_v37  ;;  %v2864_v38 = vpop.f32.mrb[4].mxu1 }
 0x531   : > { %v2988_v39 = vadd.f32 %v2864_v38, %v2544_v27  ;;  %v2162_v40 = vpop.f32.mrb[5].mxu1 }
 0x532   : > { %v2989_v41 = vadd.f32 %v2544_v27, %v2162_v40 }
 0x533   : > { %2194 = vst.msk [vmem:[%s5018_s9 + $0x28] sm:$0xff] %vm1627_vm11, %v2988_v39 }
 0x534   : > { %2193 = vst.msk [vmem:[%s5018_s9 + $0x20] sm:$0xff] %vm1627_vm11, %v2989_v41  ;;  %v2867_v42 = vpop.f32.mrb[6].mxu1 }
 0x535   : > { %v2990_v43 = vadd.f32 %v2867_v42, %v2544_v27  ;;  %v2172_v44 = vpop.f32.mrb[7].mxu1 }
 0x536   : > { %v2991_v45 = vadd.f32 %v2544_v27, %v2172_v44 }
 0x537   : > { %2196 = vst.msk [vmem:[%s5018_s9 + $0x38] sm:$0xff] %vm1627_vm11, %v2990_v43 }
 0x538   : > { %2195 = vst.msk [vmem:[%s5018_s9 + $0x30] sm:$0xff] %vm1627_vm11, %v2991_v45 }
 0x539   : > { %3575 = shalt.err (!%p3572_p11)
}
 0x53a   : > { %s3576_s21 = scalar_lea.hbm %s5105_s7, 1024  ;;  %s3580_s9 = scalar_lea.hbm %s5386_s0, 8192 }
 0x53b   : > { %p3577_p7 = scmp.ne.s32.totalorder %s5105_s7, %s3576_s21  ;;  %p3581_p6 = scmp.lt.u32.totalorder %s5105_s7, %s5386_s0 }
 0x53c   : > { %p3582_p8 = scmp.lt.u32.totalorder %s3580_s9, %s3576_s21  ;;  %p3584_p13 = scmp.lt.u32.totalorder %s3576_s21, %s5105_s7 }
 0x53d   : > { %p3578_p10 = pnand %p3577_p7, %p5387_p5 }
 0x53e   : > { %p3583_p4 = por %p3582_p8, %p3581_p6 }
 0x53f   : > { %p3579_p2 = pneg %p3578_p10 }
 0x540   : > { %p3585_p12 = por %p3584_p13, %p3583_p4 }
 0x542   : > { %p3586_p9 = pnand %p3585_p12, %p3579_p2 }
 0x544   : > { %3589 = shalt.err (!%p3586_p9)
}
 0x545   : > { %s3802_s29 = smov 128  }
 0x546   : > { %3056 = dma.vmem_to_hbm [thread:$0]  (%p5387_p5), %s5107_s12, 1024, %s5105_s7, %s2198_s24, %s3802_s29, %s3802_s29, %s3795_s26  }
 0x547 PF: > { %s5388_s14 = sld [smem:[#allocation38_spill]]  ;;  %s5389_s8 = sld [smem:[#allocation46_spill]] }
 0x548   : > { %p3100_p0 = scmp.ge.s32.totalorder %s3780_s13, 2 }
 0x54d   : > { %s2229_s22 = sand.u32 1, %s5388_s14   ;;  %p5390_p1 = scmp.ne.s32.totalorder %s5389_s8, 0 }
 0x54e   : > { %s2230_s10 = scalar_lea.sflag [#allocation7], %s2229_s22 }
 0x54f   : > { %p3088_p3 = pnand %p3100_p0, %p5390_p1 }
 0x551   : > { %3699 = dma.done.wait (!%p3088_p3), %s2230_s10, 1024  }
 0x552   : > { %3701 = vsyncadd (!%p3088_p3), %s2230_s10, 4294966272  ;;  %s35_s13 = sadd.s32 1, %s3780_s13   ;;  %s5392_s27 = sld [smem:[#allocation30_spill]] }
 0x553   : > { %p5143_p11 = scmp.ge.s32.totalorder %s35_s13, 10   ;;  %s5393_s16 = sld [smem:[#allocation31_spill]] }
 0x554   : > { %s5394_s26 = smov %s5440_s15  ;;  %s5395_s12 = sld [smem:[#allocation32_spill]] }
 0x555   : > { %s5396_s7 = sld [smem:[#allocation51_spill]]  ;;  %s5397_s20 = sld [smem:[#allocation34_spill]] }
 0x556   : > { %s5398_s21 = sld [smem:[#allocation35_spill]]  ;;  %s5399_s23 = sld [smem:[#allocation36_spill]] }
 0x557   : > { %s5400_s24 = sld [smem:[#allocation37_spill]]  ;;  %s5401_s25 = sld [smem:[#allocation50_spill]] }
 0x558   : > { %s5402_s11 = sld [smem:[#allocation39_spill]]  ;;  %s5403_s1 = sld [smem:[#allocation40_spill]] }
 0x559   : > { %s5404_s2 = sld [smem:[#allocation52_spill]]  ;;  %s5405_s29 = sld [smem:[#allocation43_spill]] }
 0x55a   : > { %s5406_s15 = smov %s5392_s27  ;;  %s5407_s30 = sld [smem:[#allocation44_spill]] }
 0x55b   : > { %s5408_s4 = sld [smem:[#allocation47_spill]]  ;;  %s5409_s17 = smov %s5394_s26 }
 0x55c   : > { %s5410_s9 = sld [smem:[#allocation48_spill]]  ;;  %s5411_s18 = smov %s3720_s19 }
 0x55d   : > { %s5412_s19 = smov %s5395_s12  ;;  %s5413_s22 = smov %s5434_s28 }
 0x55e   : > { %s5414_s26 = smov %s5402_s11  ;;  %s5415_s27 = smov %s5403_s1 }
 0x55f   : > { %s5416_s28 = smov %s5404_s2  ;;  %34 = sbr.rel (!%p5143_p11) target bundleno = 31 (0x1f), region = 188 }
 0x561   : > { %s5417_s11 = smov %s5408_s4 }
 0x562   : > { %s5418_s12 = smov %s5410_s9 }
 0x566   :  { %2235 = vsyncpa [#allocation6], 1 }
 0x567   :  { %2237 = vsyncpa [#allocation6 + $0x1], 1 }
 0x568   :  { %2238 = vsyncpa [#allocation9], 1 }
 0x569   :  { %2240 = vsyncpa [#allocation9 + $0x1], 1 }
 0x56a   :  { %2241 = vsyncpa [#allocation12], 1 }
 0x56b   :  { %2243 = vsyncpa [#allocation12 + $0x1], 1 }
 0x56c   :  { %2244 = vsyncpa [#allocation15], 1 }
 0x56d   :  { %2245 = vsyncpa [#allocation18], 1 }
 0x56e   :  { %2246 = vsyncpa [#allocation7], 1 }
 0x56f   :  { %2248 = vsyncpa [#allocation7 + $0x1], 1 }

</bundles_post_ra>
